<compile_context>
chip_gen: v6e
topology: v6e:2x2x1
jax: 0.10.0
libtpu: 0.0.40
codegen_flags: <defaults>
</compile_context>

<pallas_src>
import jax
import jax.numpy as jnp
from jax import lax
from jax.experimental import pallas as pl
from jax.experimental.pallas import tpu as pltpu


# --------------------------------- kernel -----------------------------------

def _make_kernel(scales, bn, H, W):
    f32 = jnp.float32

    def rsum(x):
        # Per-image sum over the trailing spatial axes -> (bn, 1).
        return jnp.sum(jnp.sum(x, axis=2), axis=1, keepdims=True)

    def kernel(pred_ref, targ_ref, mask_ref, out_ref):
        p = pred_ref[...]                      # (bn, H, W) f32
        t = targ_ref[...]
        m = mask_ref[...]

        # ---------- closed-form per-image scale & shift (masked LSQ) ----------
        mp = m * p
        mt = m * t
        a00 = rsum(mp * p)
        a01 = rsum(mp)
        a11 = rsum(m)
        b0 = rsum(mp * t)
        b1 = rsum(mt)

        det = a00 * a11 - a01 * a01
        valid = det != 0.0
        inv_det = 1.0 / jnp.where(valid, det, 1.0)
        scale = jnp.where(valid, (a11 * b0 - a01 * b1) * inv_det, 0.0)   # (bn,1)
        shift = jnp.where(valid, (-a01 * b0 + a00 * b1) * inv_det, 0.0)  # (bn,1)

        # ---------- SSI residual + MSE numerator (never leaves VMEM) ----------
        res = jnp.expand_dims(scale, -1) * p + jnp.expand_dims(shift, -1) - t
        d = m * res                            # mask * (pred_ssi - target)
        mse = rsum(d * res)                    # == sum(mask * res^2)

        # ---------- multi-scale gradient terms ----------
        # Separable 1-D dyadic-grid indices; no full (bn,H,W) int32 tiles.
        row_idx = lax.broadcasted_iota(jnp.int32, (1, H, 1), 1)
        col_idx = lax.broadcasted_iota(jnp.int32, (1, 1, W), 2)

        g_cols, gm_cols = [], []
        for s in range(scales):
            step = 1 << s
            if step == 1:
                # Scale-0 specialization: grid mask is the identity; its
                # mask-sum is a11 (no extra full-tile work).
                m_s = m
                gm = a11
            else:
                # Zero the mask off the dyadic grid: the |grad| * m * m
                # products below then vanish off-grid automatically, so no
                # per-term selection multiplies are needed.  `d` can stay raw
                # because every surviving pair has both endpoints on-grid.
                row_ok = ((row_idx & (step - 1)) == 0).astype(f32)   # (1,H,1)
                col_ok = ((col_idx & (step - 1)) == 0).astype(f32)   # (1,1,W)
                m_s = m * (row_ok * col_ok)
                gm = rsum(m_s)

            g = jnp.zeros((bn, 1), f32)
            if step < W:   # x-direction pairs (w, w + step)
                g = g + rsum(jnp.abs(d[:, :, step:] - d[:, :, :-step])
                             * (m_s[:, :, step:] * m_s[:, :, :-step]))
            if step < H:   # y-direction pairs (h, h + step)
                g = g + rsum(jnp.abs(d[:, step:, :] - d[:, :-step, :])
                             * (m_s[:, step:, :] * m_s[:, :-step, :]))
            g_cols.append(g)
            gm_cols.append(gm)

        # ---------- single lane-dense output store ----------
        cols = [mse] + g_cols + gm_cols                     # 1 + 2*scales cols
        pad = jnp.zeros((bn, 128 - len(cols)), f32)
        packed = jnp.concatenate(cols + [pad], axis=1)      # (bn, 128)
        out_ref[...] = jnp.expand_dims(packed, 0)           # (1, bn, 128)

    return kernel


# ------------------------------ pallas wrapper -------------------------------

def _largest_divisor_not_above(n, cap):
    cap = max(1, min(cap, n))
    for bn in range(cap, 0, -1):
        if n % bn == 0:
            return bn
    return 1


def _ssi_loss_terms(pred, target, mask, scales):
    """Fused kernel call: per-image (mse_num, grad_num[s], grad_msum[s])."""
    N, H, W = pred.shape
    assert 1 + 2 * scales <= 128

    try:
        vmem_cap = int(pltpu.get_tpu_info().vmem_capacity_bytes)
    except Exception:
        vmem_cap = 64 * 2 ** 20        # assume the smallest generation (v7x)
    # Generation-aware scoped-VMEM limit: ~46 MiB on 64 MiB parts (v7x),
    # ~92 MiB on 128 MiB parts (v5e / v6e).
    vmem_limit = max(int(0.72 * vmem_cap), 32 * 2 ** 20)

    tile_bytes = H * W * 4
    # Peak resident full-size (bn,H,W) f32 tiles: 3 inputs x 2 pipeline
    # buffers + ~12 live temporaries in the body.
    bn_vmem = max(1, int(0.85 * vmem_limit) // (18 * tile_bytes))
    bn_dma = max(1, (2 << 20) // tile_bytes)       # target ~2 MiB input tiles
    # Pick a divisor of N so no batch padding (and no extra HBM copy) is ever
    # needed; training batch sizes are normally highly composite.
    bn = _largest_divisor_not_above(N, min(bn_vmem, bn_dma))
    num_blocks = N // bn

    img_spec = pl.BlockSpec((bn, H, W), lambda n: (n, 0, 0))
    out_spec = pl.BlockSpec((1, bn, 128), lambda n: (n, 0, 0))

    out = pl.pallas_call(
        _make_kernel(scales, bn, H, W),
        grid=(num_blocks,),
        in_specs=[img_spec, img_spec, img_spec],
        out_specs=out_spec,
        out_shape=jax.ShapeDtypeStruct((num_blocks, bn, 128), jnp.float32),
        compiler_params=pltpu.CompilerParams(
            dimension_semantics=("parallel",),
            vmem_limit_bytes=vmem_limit),
    )(pred.astype(jnp.float32),
      target.astype(jnp.float32),
      mask.astype(jnp.float32))        # mask stays f32: no extra HBM cast pass

    flat = out.reshape(N, 128)
    mse_num = flat[:, 0]
    grad_num = [flat[:, 1 + s] for s in range(scales)]
    grad_msum = [flat[:, 1 + scales + s] for s in range(scales)]
    return mse_num, grad_num, grad_msum


# ----------------------------- full forward (glue) ---------------------------

def _safe_div(num, den):
    """Matches reduction_batch_based: returns 0 when the divisor is 0."""
    ok = den != 0.0
    return jnp.where(ok, num / jnp.where(ok, den, 1.0), 0.0)


def scale_and_shift_invariant_loss(prediction, target, mask, alpha=0.5, scales=4,
                                   awl_params=None):
    del alpha  # the reference forward combines via AWL, not alpha
    if awl_params is None:
        # AutomaticWeightedLoss(2): params initialized to ones (deterministic)
        awl_params = jnp.ones((2,), jnp.float32)

    mse_num, grad_num, grad_msum = _ssi_loss_terms(prediction, target, mask, scales)

    # MSELoss, batch-based reduction: sum(image_loss) / sum(2 * M)
    data_loss = _safe_div(jnp.sum(mse_num), 2.0 * jnp.sum(grad_msum[0]))

    # GradientLoss over `scales` dyadic subsamplings, batch-based per scale
    reg_loss = jnp.float32(0.0)
    for s in range(scales):
        reg_loss = reg_loss + _safe_div(jnp.sum(grad_num[s]), jnp.sum(grad_msum[s]))

    # TODO(synk): AutomaticWeightedLoss source was not provided; using the
    # standard uncertainty-weighting formulation with params initialized to ones.
    total = jnp.float32(0.0)
    for i, loss in enumerate((data_loss, reg_loss)):
        p2 = awl_params[i] * awl_params[i]
        total = total + 0.5 / p2 * loss + jnp.log(1.0 + p2)
    return total


# ------------------------- pure-JAX reference (check) ------------------------

def _reference_loss_jax(prediction, target, mask, scales=4, awl_params=None):
    if awl_params is None:
        awl_params = jnp.ones((2,), jnp.float32)

    def ssum(x):
        return jnp.sum(x, axis=(1, 2))

    a00 = ssum(mask * prediction * prediction)
    a01 = ssum(mask * prediction)
    a11 = ssum(mask)
    b0 = ssum(mask * prediction * target)
    b1 = ssum(mask * target)
    det = a00 * a11 - a01 * a01
    ok = det != 0.0
    safe_det = jnp.where(ok, det, 1.0)
    scale = jnp.where(ok, (a11 * b0 - a01 * b1) / safe_det, 0.0)
    shift = jnp.where(ok, (-a01 * b0 + a00 * b1) / safe_det, 0.0)
    pred_ssi = scale[:, None, None] * prediction + shift[:, None, None]

    res = pred_ssi - target
    data_loss = _safe_div(jnp.sum(ssum(mask * res * res)), jnp.sum(2.0 * a11))

    reg = jnp.float32(0.0)
    for s in range(scales):
        step = 2 ** s
        p_s = pred_ssi[:, ::step, ::step]
        t_s = target[:, ::step, ::step]
        m_s = mask[:, ::step, ::step]
        d = m_s * (p_s - t_s)
        gx = jnp.abs(d[:, :, 1:] - d[:, :, :-1]) * (m_s[:, :, 1:] * m_s[:, :, :-1])
        gy = jnp.abs(d[:, 1:, :] - d[:, :-1, :]) * (m_s[:, 1:, :] * m_s[:, :-1, :])
        reg = reg + _safe_div(jnp.sum(ssum(gx) + ssum(gy)), jnp.sum(ssum(m_s)))

    total = jnp.float32(0.0)
    for i, loss in enumerate((data_loss, reg)):
        p2 = awl_params[i] * awl_params[i]
        total = total + 0.5 / p2 * loss + jnp.log(1.0 + p2)
    return total


if __name__ == "__main__":
    key = jax.random.PRNGKey(0)
    k1, k2, k3 = jax.random.split(key, 3)
    N, H, W = 2, 16, 16
    prediction = jax.random.normal(k1, (N, H, W), jnp.float32)
    target = jax.random.normal(k2, (N, H, W), jnp.float32)
    mask = (jax.random.uniform(k3, (N, H, W)) > 0.3).astype(jnp.float32)

    loss = jax.jit(scale_and_shift_invariant_loss)(prediction, target, mask)
    ref = jax.jit(_reference_loss_jax)(prediction, target, mask)
    jax.block_until_ready((loss, ref))

    lv, rv = float(loss), float(ref)
    if abs(lv - rv) > (1e-4 + 1e-3 * abs(rv)):
        raise SystemExit(f"mismatch: kernel={lv} reference={rv}")
    print("KERNEL_OK")
</pallas_src>

<mosaic_0001>
module attributes {stable_mosaic.version = 11 : i64} {
  func.func @kernel(%arg0: i32, %arg1: memref<2x16x16xf32, #tpu.memory_space<vmem>>, %arg2: memref<2x16x16xf32, #tpu.memory_space<vmem>>, %arg3: memref<2x16x16xf32, #tpu.memory_space<vmem>>, %arg4: memref<1x2x128xf32, #tpu.memory_space<vmem>>) attributes {dimension_semantics = [#tpu.dimension_semantics<parallel>], iteration_bounds = array<i64: 1>, scalar_prefetch = 0 : i64, scratch_operands = 0 : i64, tpu.core_type = #tpu.core_type<tc>, window_params = [{transform_indices = @transform_0, window_bounds = array<i64: 2, 16, 16>}, {transform_indices = @transform_1, window_bounds = array<i64: 2, 16, 16>}, {transform_indices = @transform_2, window_bounds = array<i64: 2, 16, 16>}, {transform_indices = @transform_3, window_bounds = array<i64: 1, 2, 128>}]} {
    %c0 = arith.constant 0 : index
    %c0_0 = arith.constant 0 : index
    %c0_1 = arith.constant 0 : index
    %0 = vector.load %arg1[%c0, %c0_0, %c0_1] : memref<2x16x16xf32, #tpu.memory_space<vmem>>, vector<2x16x16xf32>
    %c0_2 = arith.constant 0 : index
    %c0_3 = arith.constant 0 : index
    %c0_4 = arith.constant 0 : index
    %1 = vector.load %arg2[%c0_2, %c0_3, %c0_4] : memref<2x16x16xf32, #tpu.memory_space<vmem>>, vector<2x16x16xf32>
    %c0_5 = arith.constant 0 : index
    %c0_6 = arith.constant 0 : index
    %c0_7 = arith.constant 0 : index
    %2 = vector.load %arg3[%c0_5, %c0_6, %c0_7] : memref<2x16x16xf32, #tpu.memory_space<vmem>>, vector<2x16x16xf32>
    %3 = arith.mulf %2, %0 : vector<2x16x16xf32>
    %4 = arith.mulf %2, %1 : vector<2x16x16xf32>
    %5 = arith.mulf %3, %0 : vector<2x16x16xf32>
    %cst = arith.constant dense<0.000000e+00> : vector<2x16xf32>
    %6 = vector.multi_reduction <add>, %5, %cst [2] : vector<2x16x16xf32> to vector<2x16xf32>
    %cst_8 = arith.constant dense<0.000000e+00> : vector<2xf32>
    %7 = vector.multi_reduction <add>, %6, %cst_8 [1] : vector<2x16xf32> to vector<2xf32>
    %8 = vector.shape_cast %7 : vector<2xf32> to vector<2x1xf32>
    %cst_9 = arith.constant dense<0.000000e+00> : vector<2x16xf32>
    %9 = vector.multi_reduction <add>, %3, %cst_9 [2] : vector<2x16x16xf32> to vector<2x16xf32>
    %cst_10 = arith.constant dense<0.000000e+00> : vector<2xf32>
    %10 = vector.multi_reduction <add>, %9, %cst_10 [1] : vector<2x16xf32> to vector<2xf32>
    %11 = vector.shape_cast %10 : vector<2xf32> to vector<2x1xf32>
    %cst_11 = arith.constant dense<0.000000e+00> : vector<2x16xf32>
    %12 = vector.multi_reduction <add>, %2, %cst_11 [2] : vector<2x16x16xf32> to vector<2x16xf32>
    %cst_12 = arith.constant dense<0.000000e+00> : vector<2xf32>
    %13 = vector.multi_reduction <add>, %12, %cst_12 [1] : vector<2x16xf32> to vector<2xf32>
    %14 = vector.shape_cast %13 : vector<2xf32> to vector<2x1xf32>
    %15 = arith.mulf %3, %1 : vector<2x16x16xf32>
    %cst_13 = arith.constant dense<0.000000e+00> : vector<2x16xf32>
    %16 = vector.multi_reduction <add>, %15, %cst_13 [2] : vector<2x16x16xf32> to vector<2x16xf32>
    %cst_14 = arith.constant dense<0.000000e+00> : vector<2xf32>
    %17 = vector.multi_reduction <add>, %16, %cst_14 [1] : vector<2x16xf32> to vector<2xf32>
    %18 = vector.shape_cast %17 : vector<2xf32> to vector<2x1xf32>
    %cst_15 = arith.constant dense<0.000000e+00> : vector<2x16xf32>
    %19 = vector.multi_reduction <add>, %4, %cst_15 [2] : vector<2x16x16xf32> to vector<2x16xf32>
    %cst_16 = arith.constant dense<0.000000e+00> : vector<2xf32>
    %20 = vector.multi_reduction <add>, %19, %cst_16 [1] : vector<2x16xf32> to vector<2xf32>
    %21 = vector.shape_cast %20 : vector<2xf32> to vector<2x1xf32>
    %22 = arith.mulf %8, %14 : vector<2x1xf32>
    %23 = arith.mulf %11, %11 : vector<2x1xf32>
    %24 = arith.subf %22, %23 : vector<2x1xf32>
    %cst_17 = arith.constant 0.000000e+00 : f32
    %25 = vector.broadcast %cst_17 : f32 to vector<2x1xf32>
    %26 = arith.cmpf one, %24, %25 : vector<2x1xf32>
    %cst_18 = arith.constant 1.000000e+00 : f32
    %27 = vector.broadcast %cst_18 : f32 to vector<2x1xf32>
    %28 = arith.select %26, %24, %27 : vector<2x1xi1>, vector<2x1xf32>
    %cst_19 = arith.constant 1.000000e+00 : f32
    %29 = vector.broadcast %cst_19 : f32 to vector<2x1xf32>
    %30 = arith.divf %29, %28 : vector<2x1xf32>
    %31 = arith.mulf %14, %18 : vector<2x1xf32>
    %32 = arith.mulf %11, %21 : vector<2x1xf32>
    %33 = arith.subf %31, %32 : vector<2x1xf32>
    %34 = arith.mulf %33, %30 : vector<2x1xf32>
    %cst_20 = arith.constant 0.000000e+00 : f32
    %35 = vector.broadcast %cst_20 : f32 to vector<2x1xf32>
    %36 = arith.select %26, %34, %35 : vector<2x1xi1>, vector<2x1xf32>
    %cst_21 = arith.constant 0.000000e+00 : f32
    %37 = vector.broadcast %cst_21 : f32 to vector<2x1xf32>
    %38 = arith.subf %37, %11 : vector<2x1xf32>
    %39 = arith.mulf %38, %18 : vector<2x1xf32>
    %40 = arith.mulf %8, %21 : vector<2x1xf32>
    %41 = arith.addf %39, %40 : vector<2x1xf32>
    %42 = arith.mulf %41, %30 : vector<2x1xf32>
    %cst_22 = arith.constant 0.000000e+00 : f32
    %43 = vector.broadcast %cst_22 : f32 to vector<2x1xf32>
    %44 = arith.select %26, %42, %43 : vector<2x1xi1>, vector<2x1xf32>
    %45 = vector.shape_cast %36 : vector<2x1xf32> to vector<2x1x1xf32>
    %46 = vector.broadcast %45 : vector<2x1x1xf32> to vector<2x16x16xf32>
    %47 = arith.mulf %46, %0 : vector<2x16x16xf32>
    %48 = vector.shape_cast %44 : vector<2x1xf32> to vector<2x1x1xf32>
    %49 = vector.broadcast %48 : vector<2x1x1xf32> to vector<2x16x16xf32>
    %50 = arith.addf %47, %49 : vector<2x16x16xf32>
    %51 = arith.subf %50, %1 : vector<2x16x16xf32>
    %52 = arith.mulf %2, %51 : vector<2x16x16xf32>
    %53 = arith.mulf %52, %51 : vector<2x16x16xf32>
    %cst_23 = arith.constant dense<0.000000e+00> : vector<2x16xf32>
    %54 = vector.multi_reduction <add>, %53, %cst_23 [2] : vector<2x16x16xf32> to vector<2x16xf32>
    %cst_24 = arith.constant dense<0.000000e+00> : vector<2xf32>
    %55 = vector.multi_reduction <add>, %54, %cst_24 [1] : vector<2x16xf32> to vector<2xf32>
    %56 = vector.shape_cast %55 : vector<2xf32> to vector<2x1xf32>
    %57 = tpu.iota {dimensions = array<i32: 1>} : vector<1x16x1xi32>
    %58 = tpu.iota {dimensions = array<i32: 2>} : vector<1x1x16xi32>
    %cst_25 = arith.constant 0.000000e+00 : f32
    %59 = vector.broadcast %cst_25 : f32 to vector<2x1xf32>
    %60 = vector.extract_strided_slice %52 {offsets = [0, 0, 1], sizes = [2, 16, 15], strides = [1, 1, 1]} : vector<2x16x16xf32> to vector<2x16x15xf32>
    %61 = vector.extract_strided_slice %52 {offsets = [0, 0, 0], sizes = [2, 16, 15], strides = [1, 1, 1]} : vector<2x16x16xf32> to vector<2x16x15xf32>
    %62 = arith.subf %60, %61 : vector<2x16x15xf32>
    %63 = math.absf %62 : vector<2x16x15xf32>
    %64 = vector.extract_strided_slice %2 {offsets = [0, 0, 1], sizes = [2, 16, 15], strides = [1, 1, 1]} : vector<2x16x16xf32> to vector<2x16x15xf32>
    %65 = vector.extract_strided_slice %2 {offsets = [0, 0, 0], sizes = [2, 16, 15], strides = [1, 1, 1]} : vector<2x16x16xf32> to vector<2x16x15xf32>
    %66 = arith.mulf %64, %65 : vector<2x16x15xf32>
    %67 = arith.mulf %63, %66 : vector<2x16x15xf32>
    %cst_26 = arith.constant dense<0.000000e+00> : vector<2x16xf32>
    %68 = vector.multi_reduction <add>, %67, %cst_26 [2] : vector<2x16x15xf32> to vector<2x16xf32>
    %cst_27 = arith.constant dense<0.000000e+00> : vector<2xf32>
    %69 = vector.multi_reduction <add>, %68, %cst_27 [1] : vector<2x16xf32> to vector<2xf32>
    %70 = vector.shape_cast %69 : vector<2xf32> to vector<2x1xf32>
    %71 = arith.addf %59, %70 : vector<2x1xf32>
    %72 = vector.extract_strided_slice %52 {offsets = [0, 1, 0], sizes = [2, 15, 16], strides = [1, 1, 1]} : vector<2x16x16xf32> to vector<2x15x16xf32>
    %73 = vector.extract_strided_slice %52 {offsets = [0, 0, 0], sizes = [2, 15, 16], strides = [1, 1, 1]} : vector<2x16x16xf32> to vector<2x15x16xf32>
    %74 = arith.subf %72, %73 : vector<2x15x16xf32>
    %75 = math.absf %74 : vector<2x15x16xf32>
    %76 = vector.extract_strided_slice %2 {offsets = [0, 1, 0], sizes = [2, 15, 16], strides = [1, 1, 1]} : vector<2x16x16xf32> to vector<2x15x16xf32>
    %77 = vector.extract_strided_slice %2 {offsets = [0, 0, 0], sizes = [2, 15, 16], strides = [1, 1, 1]} : vector<2x16x16xf32> to vector<2x15x16xf32>
    %78 = arith.mulf %76, %77 : vector<2x15x16xf32>
    %79 = arith.mulf %75, %78 : vector<2x15x16xf32>
    %cst_28 = arith.constant dense<0.000000e+00> : vector<2x15xf32>
    %80 = vector.multi_reduction <add>, %79, %cst_28 [2] : vector<2x15x16xf32> to vector<2x15xf32>
    %cst_29 = arith.constant dense<0.000000e+00> : vector<2xf32>
    %81 = vector.multi_reduction <add>, %80, %cst_29 [1] : vector<2x15xf32> to vector<2xf32>
    %82 = vector.shape_cast %81 : vector<2xf32> to vector<2x1xf32>
    %83 = arith.addf %71, %82 : vector<2x1xf32>
    %c1_i32 = arith.constant 1 : i32
    %84 = vector.broadcast %c1_i32 : i32 to vector<1x16x1xi32>
    %85 = arith.andi %57, %84 : vector<1x16x1xi32>
    %c0_i32 = arith.constant 0 : i32
    %86 = vector.broadcast %c0_i32 : i32 to vector<1x16x1xi32>
    %87 = arith.cmpi eq, %85, %86 : vector<1x16x1xi32>
    %88 = arith.extui %87 : vector<1x16x1xi1> to vector<1x16x1xi32>
    %89 = arith.sitofp %88 : vector<1x16x1xi32> to vector<1x16x1xf32>
    %c1_i32_30 = arith.constant 1 : i32
    %90 = vector.broadcast %c1_i32_30 : i32 to vector<1x1x16xi32>
    %91 = arith.andi %58, %90 : vector<1x1x16xi32>
    %c0_i32_31 = arith.constant 0 : i32
    %92 = vector.broadcast %c0_i32_31 : i32 to vector<1x1x16xi32>
    %93 = arith.cmpi eq, %91, %92 : vector<1x1x16xi32>
    %94 = arith.extui %93 : vector<1x1x16xi1> to vector<1x1x16xi32>
    %95 = arith.sitofp %94 : vector<1x1x16xi32> to vector<1x1x16xf32>
    %96 = vector.broadcast %89 : vector<1x16x1xf32> to vector<1x16x16xf32>
    %97 = vector.broadcast %95 : vector<1x1x16xf32> to vector<1x16x16xf32>
    %98 = arith.mulf %96, %97 : vector<1x16x16xf32>
    %99 = vector.broadcast %98 : vector<1x16x16xf32> to vector<2x16x16xf32>
    %100 = arith.mulf %2, %99 : vector<2x16x16xf32>
    %cst_32 = arith.constant dense<0.000000e+00> : vector<2x16xf32>
    %101 = vector.multi_reduction <add>, %100, %cst_32 [2] : vector<2x16x16xf32> to vector<2x16xf32>
    %cst_33 = arith.constant dense<0.000000e+00> : vector<2xf32>
    %102 = vector.multi_reduction <add>, %101, %cst_33 [1] : vector<2x16xf32> to vector<2xf32>
    %103 = vector.shape_cast %102 : vector<2xf32> to vector<2x1xf32>
    %cst_34 = arith.constant 0.000000e+00 : f32
    %104 = vector.broadcast %cst_34 : f32 to vector<2x1xf32>
    %105 = vector.extract_strided_slice %52 {offsets = [0, 0, 2], sizes = [2, 16, 14], strides = [1, 1, 1]} : vector<2x16x16xf32> to vector<2x16x14xf32>
    %106 = vector.extract_strided_slice %52 {offsets = [0, 0, 0], sizes = [2, 16, 14], strides = [1, 1, 1]} : vector<2x16x16xf32> to vector<2x16x14xf32>
    %107 = arith.subf %105, %106 : vector<2x16x14xf32>
    %108 = math.absf %107 : vector<2x16x14xf32>
    %109 = vector.extract_strided_slice %100 {offsets = [0, 0, 2], sizes = [2, 16, 14], strides = [1, 1, 1]} : vector<2x16x16xf32> to vector<2x16x14xf32>
    %110 = vector.extract_strided_slice %100 {offsets = [0, 0, 0], sizes = [2, 16, 14], strides = [1, 1, 1]} : vector<2x16x16xf32> to vector<2x16x14xf32>
    %111 = arith.mulf %109, %110 : vector<2x16x14xf32>
    %112 = arith.mulf %108, %111 : vector<2x16x14xf32>
    %cst_35 = arith.constant dense<0.000000e+00> : vector<2x16xf32>
    %113 = vector.multi_reduction <add>, %112, %cst_35 [2] : vector<2x16x14xf32> to vector<2x16xf32>
    %cst_36 = arith.constant dense<0.000000e+00> : vector<2xf32>
    %114 = vector.multi_reduction <add>, %113, %cst_36 [1] : vector<2x16xf32> to vector<2xf32>
    %115 = vector.shape_cast %114 : vector<2xf32> to vector<2x1xf32>
    %116 = arith.addf %104, %115 : vector<2x1xf32>
    %117 = vector.extract_strided_slice %52 {offsets = [0, 2, 0], sizes = [2, 14, 16], strides = [1, 1, 1]} : vector<2x16x16xf32> to vector<2x14x16xf32>
    %118 = vector.extract_strided_slice %52 {offsets = [0, 0, 0], sizes = [2, 14, 16], strides = [1, 1, 1]} : vector<2x16x16xf32> to vector<2x14x16xf32>
    %119 = arith.subf %117, %118 : vector<2x14x16xf32>
    %120 = math.absf %119 : vector<2x14x16xf32>
    %121 = vector.extract_strided_slice %100 {offsets = [0, 2, 0], sizes = [2, 14, 16], strides = [1, 1, 1]} : vector<2x16x16xf32> to vector<2x14x16xf32>
    %122 = vector.extract_strided_slice %100 {offsets = [0, 0, 0], sizes = [2, 14, 16], strides = [1, 1, 1]} : vector<2x16x16xf32> to vector<2x14x16xf32>
    %123 = arith.mulf %121, %122 : vector<2x14x16xf32>
    %124 = arith.mulf %120, %123 : vector<2x14x16xf32>
    %cst_37 = arith.constant dense<0.000000e+00> : vector<2x14xf32>
    %125 = vector.multi_reduction <add>, %124, %cst_37 [2] : vector<2x14x16xf32> to vector<2x14xf32>
    %cst_38 = arith.constant dense<0.000000e+00> : vector<2xf32>
    %126 = vector.multi_reduction <add>, %125, %cst_38 [1] : vector<2x14xf32> to vector<2xf32>
    %127 = vector.shape_cast %126 : vector<2xf32> to vector<2x1xf32>
    %128 = arith.addf %116, %127 : vector<2x1xf32>
    %c3_i32 = arith.constant 3 : i32
    %129 = vector.broadcast %c3_i32 : i32 to vector<1x16x1xi32>
    %130 = arith.andi %57, %129 : vector<1x16x1xi32>
    %c0_i32_39 = arith.constant 0 : i32
    %131 = vector.broadcast %c0_i32_39 : i32 to vector<1x16x1xi32>
    %132 = arith.cmpi eq, %130, %131 : vector<1x16x1xi32>
    %133 = arith.extui %132 : vector<1x16x1xi1> to vector<1x16x1xi32>
    %134 = arith.sitofp %133 : vector<1x16x1xi32> to vector<1x16x1xf32>
    %c3_i32_40 = arith.constant 3 : i32
    %135 = vector.broadcast %c3_i32_40 : i32 to vector<1x1x16xi32>
    %136 = arith.andi %58, %135 : vector<1x1x16xi32>
    %c0_i32_41 = arith.constant 0 : i32
    %137 = vector.broadcast %c0_i32_41 : i32 to vector<1x1x16xi32>
    %138 = arith.cmpi eq, %136, %137 : vector<1x1x16xi32>
    %139 = arith.extui %138 : vector<1x1x16xi1> to vector<1x1x16xi32>
    %140 = arith.sitofp %139 : vector<1x1x16xi32> to vector<1x1x16xf32>
    %141 = vector.broadcast %134 : vector<1x16x1xf32> to vector<1x16x16xf32>
    %142 = vector.broadcast %140 : vector<1x1x16xf32> to vector<1x16x16xf32>
    %143 = arith.mulf %141, %142 : vector<1x16x16xf32>
    %144 = vector.broadcast %143 : vector<1x16x16xf32> to vector<2x16x16xf32>
    %145 = arith.mulf %2, %144 : vector<2x16x16xf32>
    %cst_42 = arith.constant dense<0.000000e+00> : vector<2x16xf32>
    %146 = vector.multi_reduction <add>, %145, %cst_42 [2] : vector<2x16x16xf32> to vector<2x16xf32>
    %cst_43 = arith.constant dense<0.000000e+00> : vector<2xf32>
    %147 = vector.multi_reduction <add>, %146, %cst_43 [1] : vector<2x16xf32> to vector<2xf32>
    %148 = vector.shape_cast %147 : vector<2xf32> to vector<2x1xf32>
    %cst_44 = arith.constant 0.000000e+00 : f32
    %149 = vector.broadcast %cst_44 : f32 to vector<2x1xf32>
    %150 = vector.extract_strided_slice %52 {offsets = [0, 0, 4], sizes = [2, 16, 12], strides = [1, 1, 1]} : vector<2x16x16xf32> to vector<2x16x12xf32>
    %151 = vector.extract_strided_slice %52 {offsets = [0, 0, 0], sizes = [2, 16, 12], strides = [1, 1, 1]} : vector<2x16x16xf32> to vector<2x16x12xf32>
    %152 = arith.subf %150, %151 : vector<2x16x12xf32>
    %153 = math.absf %152 : vector<2x16x12xf32>
    %154 = vector.extract_strided_slice %145 {offsets = [0, 0, 4], sizes = [2, 16, 12], strides = [1, 1, 1]} : vector<2x16x16xf32> to vector<2x16x12xf32>
    %155 = vector.extract_strided_slice %145 {offsets = [0, 0, 0], sizes = [2, 16, 12], strides = [1, 1, 1]} : vector<2x16x16xf32> to vector<2x16x12xf32>
    %156 = arith.mulf %154, %155 : vector<2x16x12xf32>
    %157 = arith.mulf %153, %156 : vector<2x16x12xf32>
    %cst_45 = arith.constant dense<0.000000e+00> : vector<2x16xf32>
    %158 = vector.multi_reduction <add>, %157, %cst_45 [2] : vector<2x16x12xf32> to vector<2x16xf32>
    %cst_46 = arith.constant dense<0.000000e+00> : vector<2xf32>
    %159 = vector.multi_reduction <add>, %158, %cst_46 [1] : vector<2x16xf32> to vector<2xf32>
    %160 = vector.shape_cast %159 : vector<2xf32> to vector<2x1xf32>
    %161 = arith.addf %149, %160 : vector<2x1xf32>
    %162 = vector.extract_strided_slice %52 {offsets = [0, 4, 0], sizes = [2, 12, 16], strides = [1, 1, 1]} : vector<2x16x16xf32> to vector<2x12x16xf32>
    %163 = vector.extract_strided_slice %52 {offsets = [0, 0, 0], sizes = [2, 12, 16], strides = [1, 1, 1]} : vector<2x16x16xf32> to vector<2x12x16xf32>
    %164 = arith.subf %162, %163 : vector<2x12x16xf32>
    %165 = math.absf %164 : vector<2x12x16xf32>
    %166 = vector.extract_strided_slice %145 {offsets = [0, 4, 0], sizes = [2, 12, 16], strides = [1, 1, 1]} : vector<2x16x16xf32> to vector<2x12x16xf32>
    %167 = vector.extract_strided_slice %145 {offsets = [0, 0, 0], sizes = [2, 12, 16], strides = [1, 1, 1]} : vector<2x16x16xf32> to vector<2x12x16xf32>
    %168 = arith.mulf %166, %167 : vector<2x12x16xf32>
    %169 = arith.mulf %165, %168 : vector<2x12x16xf32>
    %cst_47 = arith.constant dense<0.000000e+00> : vector<2x12xf32>
    %170 = vector.multi_reduction <add>, %169, %cst_47 [2] : vector<2x12x16xf32> to vector<2x12xf32>
    %cst_48 = arith.constant dense<0.000000e+00> : vector<2xf32>
    %171 = vector.multi_reduction <add>, %170, %cst_48 [1] : vector<2x12xf32> to vector<2xf32>
    %172 = vector.shape_cast %171 : vector<2xf32> to vector<2x1xf32>
    %173 = arith.addf %161, %172 : vector<2x1xf32>
    %c7_i32 = arith.constant 7 : i32
    %174 = vector.broadcast %c7_i32 : i32 to vector<1x16x1xi32>
    %175 = arith.andi %57, %174 : vector<1x16x1xi32>
    %c0_i32_49 = arith.constant 0 : i32
    %176 = vector.broadcast %c0_i32_49 : i32 to vector<1x16x1xi32>
    %177 = arith.cmpi eq, %175, %176 : vector<1x16x1xi32>
    %178 = arith.extui %177 : vector<1x16x1xi1> to vector<1x16x1xi32>
    %179 = arith.sitofp %178 : vector<1x16x1xi32> to vector<1x16x1xf32>
    %c7_i32_50 = arith.constant 7 : i32
    %180 = vector.broadcast %c7_i32_50 : i32 to vector<1x1x16xi32>
    %181 = arith.andi %58, %180 : vector<1x1x16xi32>
    %c0_i32_51 = arith.constant 0 : i32
    %182 = vector.broadcast %c0_i32_51 : i32 to vector<1x1x16xi32>
    %183 = arith.cmpi eq, %181, %182 : vector<1x1x16xi32>
    %184 = arith.extui %183 : vector<1x1x16xi1> to vector<1x1x16xi32>
    %185 = arith.sitofp %184 : vector<1x1x16xi32> to vector<1x1x16xf32>
    %186 = vector.broadcast %179 : vector<1x16x1xf32> to vector<1x16x16xf32>
    %187 = vector.broadcast %185 : vector<1x1x16xf32> to vector<1x16x16xf32>
    %188 = arith.mulf %186, %187 : vector<1x16x16xf32>
    %189 = vector.broadcast %188 : vector<1x16x16xf32> to vector<2x16x16xf32>
    %190 = arith.mulf %2, %189 : vector<2x16x16xf32>
    %cst_52 = arith.constant dense<0.000000e+00> : vector<2x16xf32>
    %191 = vector.multi_reduction <add>, %190, %cst_52 [2] : vector<2x16x16xf32> to vector<2x16xf32>
    %cst_53 = arith.constant dense<0.000000e+00> : vector<2xf32>
    %192 = vector.multi_reduction <add>, %191, %cst_53 [1] : vector<2x16xf32> to vector<2xf32>
    %193 = vector.shape_cast %192 : vector<2xf32> to vector<2x1xf32>
    %cst_54 = arith.constant 0.000000e+00 : f32
    %194 = vector.broadcast %cst_54 : f32 to vector<2x1xf32>
    %195 = vector.extract_strided_slice %52 {offsets = [0, 0, 8], sizes = [2, 16, 8], strides = [1, 1, 1]} : vector<2x16x16xf32> to vector<2x16x8xf32>
    %196 = vector.extract_strided_slice %52 {offsets = [0, 0, 0], sizes = [2, 16, 8], strides = [1, 1, 1]} : vector<2x16x16xf32> to vector<2x16x8xf32>
    %197 = arith.subf %195, %196 : vector<2x16x8xf32>
    %198 = math.absf %197 : vector<2x16x8xf32>
    %199 = vector.extract_strided_slice %190 {offsets = [0, 0, 8], sizes = [2, 16, 8], strides = [1, 1, 1]} : vector<2x16x16xf32> to vector<2x16x8xf32>
    %200 = vector.extract_strided_slice %190 {offsets = [0, 0, 0], sizes = [2, 16, 8], strides = [1, 1, 1]} : vector<2x16x16xf32> to vector<2x16x8xf32>
    %201 = arith.mulf %199, %200 : vector<2x16x8xf32>
    %202 = arith.mulf %198, %201 : vector<2x16x8xf32>
    %cst_55 = arith.constant dense<0.000000e+00> : vector<2x16xf32>
    %203 = vector.multi_reduction <add>, %202, %cst_55 [2] : vector<2x16x8xf32> to vector<2x16xf32>
    %cst_56 = arith.constant dense<0.000000e+00> : vector<2xf32>
    %204 = vector.multi_reduction <add>, %203, %cst_56 [1] : vector<2x16xf32> to vector<2xf32>
    %205 = vector.shape_cast %204 : vector<2xf32> to vector<2x1xf32>
    %206 = arith.addf %194, %205 : vector<2x1xf32>
    %207 = vector.extract_strided_slice %52 {offsets = [0, 8, 0], sizes = [2, 8, 16], strides = [1, 1, 1]} : vector<2x16x16xf32> to vector<2x8x16xf32>
    %208 = vector.extract_strided_slice %52 {offsets = [0, 0, 0], sizes = [2, 8, 16], strides = [1, 1, 1]} : vector<2x16x16xf32> to vector<2x8x16xf32>
    %209 = arith.subf %207, %208 : vector<2x8x16xf32>
    %210 = math.absf %209 : vector<2x8x16xf32>
    %211 = vector.extract_strided_slice %190 {offsets = [0, 8, 0], sizes = [2, 8, 16], strides = [1, 1, 1]} : vector<2x16x16xf32> to vector<2x8x16xf32>
    %212 = vector.extract_strided_slice %190 {offsets = [0, 0, 0], sizes = [2, 8, 16], strides = [1, 1, 1]} : vector<2x16x16xf32> to vector<2x8x16xf32>
    %213 = arith.mulf %211, %212 : vector<2x8x16xf32>
    %214 = arith.mulf %210, %213 : vector<2x8x16xf32>
    %cst_57 = arith.constant dense<0.000000e+00> : vector<2x8xf32>
    %215 = vector.multi_reduction <add>, %214, %cst_57 [2] : vector<2x8x16xf32> to vector<2x8xf32>
    %cst_58 = arith.constant dense<0.000000e+00> : vector<2xf32>
    %216 = vector.multi_reduction <add>, %215, %cst_58 [1] : vector<2x8xf32> to vector<2xf32>
    %217 = vector.shape_cast %216 : vector<2xf32> to vector<2x1xf32>
    %218 = arith.addf %206, %217 : vector<2x1xf32>
    %cst_59 = arith.constant 0.000000e+00 : f32
    %219 = vector.broadcast %cst_59 : f32 to vector<2x119xf32>
    %220 = tpu.concatenate %56, %83, %128, %173, %218, %14, %103, %148, %193, %219 in 1 : vector<2x1xf32>, vector<2x1xf32>, vector<2x1xf32>, vector<2x1xf32>, vector<2x1xf32>, vector<2x1xf32>, vector<2x1xf32>, vector<2x1xf32>, vector<2x1xf32>, vector<2x119xf32> -> vector<2x128xf32>
    %221 = vector.shape_cast %220 : vector<2x128xf32> to vector<1x2x128xf32>
    %c0_60 = arith.constant 0 : index
    %c0_61 = arith.constant 0 : index
    %c0_62 = arith.constant 0 : index
    %222 = vector.load %arg4[%c0_60, %c0_61, %c0_62] : memref<1x2x128xf32, #tpu.memory_space<vmem>>, vector<1x2x128xf32>
    tpu.vector_store %arg4[%c0_60, %c0_61, %c0_62], %221 {strides = array<i32>} : memref<1x2x128xf32, #tpu.memory_space<vmem>>, vector<1x2x128xf32>,
    return
  }
  func.func @transform_0(%arg0: i32) -> (i32, i32, i32) {
    %c0_i32 = arith.constant 0 : i32
    %c0_i32_0 = arith.constant 0 : i32
    %c0_i32_1 = arith.constant 0 : i32
    return %arg0, %c0_i32, %c0_i32_0 : i32, i32, i32
  }
  func.func @transform_1(%arg0: i32) -> (i32, i32, i32) {
    %c0_i32 = arith.constant 0 : i32
    %c0_i32_0 = arith.constant 0 : i32
    %c0_i32_1 = arith.constant 0 : i32
    return %arg0, %c0_i32, %c0_i32_0 : i32, i32, i32
  }
  func.func @transform_2(%arg0: i32) -> (i32, i32, i32) {
    %c0_i32 = arith.constant 0 : i32
    %c0_i32_0 = arith.constant 0 : i32
    %c0_i32_1 = arith.constant 0 : i32
    return %arg0, %c0_i32, %c0_i32_0 : i32, i32, i32
  }
  func.func @transform_3(%arg0: i32) -> (i32, i32, i32) {
    %c0_i32 = arith.constant 0 : i32
    %c0_i32_0 = arith.constant 0 : i32
    %c0_i32_1 = arith.constant 0 : i32
    return %arg0, %c0_i32, %c0_i32_0 : i32, i32, i32
  }
}

</mosaic_0001>

<bundles_post_ra>
// kernel: scale_and_shift_invariant_loss.1
= control target key start
LH: loop header
LB: loop body
LE: loop exit
PB: predicated region body
PF: predicated region fallthrough
CT: control target
= control target key end

     0   :  { %8 = vsyncpa [#allocation3], 0  ;;  %s2002_s0 = inlined_call_operand.hbm [shape: f32[2,16,16], index: 0, kind: input, shape index: {}]   ;;  %s2003_s1 = inlined_call_operand.hbm [shape: f32[2,16,16], index: 1, kind: input, shape index: {}]   ;;  %s2004_s2 = inlined_call_operand.hbm [shape: f32[2,16,16], index: 2, kind: input, shape index: {}]   ;;  %s2005_s3 = inlined_call_operand.vmem [shape: f32[1,2,128], index: 3, kind: output, shape index: {}]  }
   0x1   :  { %9 = vsyncpa [#allocation5], 0  ;;  %s1355_s12 = smov [#allocation4]   ;;  %s1356_s14 = smov [#allocation2]  }
   0x2   :  { %s27_s13 = sshll.u32 %s1355_s12, 4  ;;  %s15_s15 = sshll.u32 %s1356_s14, 4  ;;  %s28_s13 = int_to_ptr.vmem [resolvable:$true] %s27_s13  ;;  %s16_s15 = int_to_ptr.vmem [resolvable:$true] %s15_s15 }
   0x3   :  { %s1299_s16 = scalar_lea.vmem %s28_s13, 512  ;;  %p1304_p1 = scmp.lt.s32.totalorder %s28_s13, %s28_s13 }
   0x4   :  { %p1300_p0 = scmp.ne.s32.totalorder %s28_s13, %s1299_s16  ;;  %p1305_p2 = scmp.lt.s32.totalorder %s1299_s16, %s1299_s16 }
   0x6   :  { %p1306_p3 = por %p1305_p2, %p1304_p1 }
   0x8   :  { %p1307_p4 = pnand %p1306_p3, %p1300_p0 }
   0xa   :  { %1310 = shalt.err (!%p1307_p4)
}
   0xb   :  { %s1357_s17 = smov 128   ;;  %s1358_s18 = smov 8  }
   0xc   :  { %33 = dma.hbm_to_vmem [thread:$0]  %s2003_s1, 512, %s28_s13, [#allocation5], %s1357_s17, %s1357_s17, %s1358_s18  }
   0xd   :  { %s1319_s21 = scalar_lea.vmem %s16_s15, 512  ;;  %p1324_p6 = scmp.lt.s32.totalorder %s16_s15, %s16_s15 }
   0xe   :  { %p1320_p5 = scmp.ne.s32.totalorder %s16_s15, %s1319_s21  ;;  %p1325_p7 = scmp.lt.s32.totalorder %s1319_s21, %s1319_s21 }
  0x10   :  { %p1326_p8 = por %p1325_p7, %p1324_p6 }
  0x12   :  { %p1327_p9 = pnand %p1326_p8, %p1320_p5 }
  0x14   :  { %1330 = shalt.err (!%p1327_p9)
}
  0x15   :  { %21 = dma.hbm_to_vmem [thread:$0]  %s2002_s0, 512, %s16_s15, [#allocation3], %s1357_s17, %s1357_s17, %s1358_s18  }
  0x16   :  { %s1359_s24 = smov [#allocation6]  }
  0x17   :  { %s39_s25 = sshll.u32 %s1359_s24, 4  ;;  %s40_s25 = int_to_ptr.vmem [resolvable:$true] %s39_s25 }
  0x18   :  { %s1339_s26 = scalar_lea.vmem %s40_s25, 512  ;;  %p1344_p11 = scmp.lt.s32.totalorder %s40_s25, %s40_s25 }
  0x19   :  { %p1340_p10 = scmp.ne.s32.totalorder %s40_s25, %s1339_s26  ;;  %p1345_p12 = scmp.lt.s32.totalorder %s1339_s26, %s1339_s26 }
  0x1b   :  { %p1346_p13 = por %p1345_p12, %p1344_p11 }
  0x1d   :  { %p1347_p0 = pnand %p1346_p13, %p1340_p10 }
  0x1f   :  { %1350 = shalt.err (!%p1347_p0)
}
  0x20   :  { %45 = dma.hbm_to_vmem [thread:$0]  %s2004_s2, 512, %s40_s25, [#allocation5], %s1357_s17, %s1357_s17, %s1358_s18  }
  0x21   :  { %1351 = dma.done.wait [#allocation3], 512  }
  0x22   :  { %1352 = vsyncadd [#allocation3], 4294966784 }
  0x23   :  { %1353 = dma.done.wait [#allocation5], 1024  }
  0x24   :  { %1354 = vsyncadd [#allocation5], 4294966272  ;;  %v1400_v0 = vld [vmem:[#allocation2 + $0x8] sm:$0xff]  ;;  %vm79_vm0 = vcmask 130048   ;;  %v1404_v2 = vld [vmem:[#allocation2] sm:$0xff]  ;;  %v96_v46 = vlaneseq  ;;  %v1360_v55 = vmov 0.0  }
  0x25   :  { %v1402_v1 = vld [vmem:[#allocation6 + $0x8] sm:$0xff]  ;;  %v1408_v4 = vld [vmem:[#allocation6] sm:$0xff]  ;;  %v1410_v5 = vld [vmem:[#allocation2 + $0x18] sm:$0xff]  ;;  %s1361_s0 = smov 1   ;;  %s1362_s2 = smov 2   ;;  %vm107_vm10 = vcmask 130112  }
  0x26   :  { %v68_v3 = vmul.f32 %v1402_v1, %v1400_v0  ;;  %v1412_v6 = vld [vmem:[#allocation6 + $0x18] sm:$0xff]  ;;  %v67_v7 = vmul.f32 %v1408_v4, %v1404_v2  ;;  %v1418_v9 = vld [vmem:[#allocation2 + $0x10] sm:$0xff]  ;;  %v167_v24 = vsel %vm79_vm0, %v1402_v1, 0.0  ;;  %v164_v25 = vsel %vm79_vm0, %v1408_v4, 0.0  ;;  %v1440_v26 = vld [vmem:[#allocation4 + $0x8] sm:$0xff]  ;;  %s1363_s28 = smov 4  }
  0x27   :  { %v70_v8 = vmul.f32 %v1412_v6, %v1410_v5  ;;  %v1420_v10 = vld [vmem:[#allocation6 + $0x10] sm:$0xff]  ;;  %v1442_v27 = vld [vmem:[#allocation4] sm:$0xff]  ;;  %v173_v28 = vsel %vm79_vm0, %v1412_v6, 0.0  ;;  %v1450_v32 = vld [vmem:[#allocation4 + $0x18] sm:$0xff]  ;;  %v72_v39 = vmul.f32 %v1402_v1, %v1440_v26  ;;  %v1472_v49 = vshrl.u32 %v96_v46, 7  ;;  %s1364_s29 = smov 127  }
  0x28   :  { %v128_v11 = vsel %vm79_vm0, %v68_v3, 0.0  ;;  %v69_v12 = vmul.f32 %v1420_v10, %v1418_v9  ;;  %v125_v13 = vsel %vm79_vm0, %v67_v7, 0.0  ;;  %v75_v17 = vmul.f32 %v67_v7, %v1404_v2  ;;  %v1452_v33 = vld [vmem:[#allocation4 + $0x10] sm:$0xff]  ;;  %s1365_s30 = smov 126   ;;  %s1366_s4 = smov 124  }
  0x29   :  { %129 = vadd.xlane.f32.xlu1 %v128_v11  ;;  %126 = vadd.xlane.f32.xlu0 %v125_v13  ;;  %v134_v14 = vsel %vm79_vm0, %v70_v8, 0.0  ;;  %v78_v19 = vmul.f32 %v70_v8, %v1410_v5  ;;  %v76_v21 = vmul.f32 %v68_v3, %v1400_v0  ;;  %v204_v29 = vmul.f32 %v68_v3, %v1440_v26  ;;  %s1367_s5 = smov 120  }
  0x2a   :  { %v77_v15 = vmul.f32 %v69_v12, %v1418_v9  ;;  %v131_v16 = vsel %vm79_vm0, %v69_v12, 0.0  ;;  %v80_v20 = vsel %vm79_vm0, %v75_v17, 0.0  ;;  %v170_v30 = vsel %vm79_vm0, %v1420_v10, 0.0  ;;  %2023 = vst [vmem:[#allocation9_spill] sm:$0xff] %v1472_v49 }
  0x2b   :  { %v89_v22 = vsel %vm79_vm0, %v78_v19, 0.0  ;;  %v83_v23 = vsel %vm79_vm0, %v76_v21, 0.0  ;;  %v203_v31 = vmul.f32 %v67_v7, %v1442_v27  ;;  %v210_v34 = vsel %vm79_vm0, %v204_v29, 0.0 }
  0x2c   :  { %v86_v18 = vsel %vm79_vm0, %v77_v15, 0.0  ;;  %v206_v35 = vmul.f32 %v70_v8, %v1450_v32  ;;  %v205_v37 = vmul.f32 %v69_v12, %v1452_v33  ;;  %v71_v41 = vmul.f32 %v1408_v4, %v1442_v27 }
  0x2d   :  { %135 = vadd.xlane.f32.xlu1 %v134_v14  ;;  %132 = vadd.xlane.f32.xlu0 %v131_v16  ;;  %v207_v36 = vsel %vm79_vm0, %v203_v31, 0.0  ;;  %v249_v42 = vsel %vm79_vm0, %v72_v39, 0.0  ;;  %v74_v43 = vmul.f32 %v1412_v6, %v1450_v32  ;;  %v73_v45 = vmul.f32 %v1420_v10, %v1452_v33 }
  0x2e   :  { %v216_v38 = vsel %vm79_vm0, %v206_v35, 0.0  ;;  %v213_v40 = vsel %vm79_vm0, %v205_v37, 0.0  ;;  %v246_v44 = vsel %vm79_vm0, %v71_v41, 0.0  ;;  %v1474_v50 = vand.u32 127, %v96_v46 }
  0x2f   :  { %v255_v47 = vsel %vm79_vm0, %v74_v43, 0.0  ;;  %v252_v48 = vsel %vm79_vm0, %v73_v45, 0.0  ;;  %v386_v51 = vadd.s32 8, %v1472_v49  ;;  %v574_v54 = vand.u32 1, %v1472_v49 }
  0x30   :  { %2024 = vst [vmem:[#allocation10_spill] sm:$0xff] %v1474_v50  ;;  %v582_v53 = vand.u32 1, %v1474_v50  ;;  %v822_v59 = vand.u32 3, %v1474_v50  ;;  %v814_v63 = vand.u32 3, %v1472_v49  ;;  %v1062_v11 = vand.u32 7, %v1474_v50 }
  0x31   :  { %87 = vadd.xlane.f32.xlu1 %v86_v18  ;;  %81 = vadd.xlane.f32.xlu0 %v80_v20  ;;  %v575_v52 = vand.u32 1, %v386_v51  ;;  %v815_v58 = vand.u32 3, %v386_v51  ;;  %vm576_vm3 = vcmp.eq.s32.totalorder %v574_v54, 0  ;;  %v1055_v8 = vand.u32 7, %v386_v51 }
  0x32   :  { %vm583_vm2 = vcmp.eq.s32.totalorder %v582_v53, 0  ;;  %vm823_vm5 = vcmp.eq.s32.totalorder %v822_v59, 0  ;;  %v1267_v61 = vsel %vm576_vm3, 1.0, %v1360_v55  ;;  %vm816_vm6 = vcmp.eq.s32.totalorder %v814_v63, 0 }
  0x33   :  { %vm577_vm1 = vcmp.eq.s32.totalorder %v575_v52, 0  ;;  %v1269_v57 = vsel %vm583_vm2, 1.0, %v1360_v55  ;;  %vm817_vm4 = vcmp.eq.s32.totalorder %v815_v58, 0  ;;  %v1272_v7 = vsel %vm823_vm5, 1.0, %v1360_v55 }
  0x34   :  { %v1268_v56 = vsel %vm577_vm1, 1.0, %v1360_v55  ;;  %v1271_v3 = vsel %vm817_vm4, 1.0, %v1360_v55  ;;  %v586_v12 = vmul.f32 %v1269_v57, %v1267_v61  ;;  %vm1057_vm7 = vcmp.eq.s32.totalorder %v1055_v8, 0 }
  0x35   :  { %90 = vadd.xlane.f32.xlu1 %v89_v22  ;;  %84 = vadd.xlane.f32.xlu0 %v83_v23  ;;  %v587_v60 = vmul.f32 %v1269_v57, %v1268_v56  ;;  %v827_v14 = vmul.f32 %v1272_v7, %v1271_v3  ;;  %vm1063_vm8 = vcmp.eq.s32.totalorder %v1062_v11, 0  ;;  %v1270_v16 = vsel %vm816_vm6, 1.0, %v1360_v55 }
  0x36   :  { %v1499_v15 = vmul.f32 %v586_v12, %v1408_v4  ;;  %v1054_v18 = vand.u32 7, %v1472_v49  ;;  %v1274_v19 = vsel %vm1057_vm7, 1.0, %v1360_v55  ;;  %v1275_v20 = vsel %vm1063_vm8, 1.0, %v1360_v55 }
  0x37   :  { %v1485_v62 = vmul.f32 %v587_v60, %v1402_v1  ;;  %v1494_v13 = vmul.f32 %v587_v60, %v1412_v6  ;;  %v1504_v17 = vmul.f32 %v827_v14, %v1402_v1  ;;  %v1510_v21 = vmul.f32 %v586_v12, %v1420_v10 }
  0x38   :  { %v826_v22 = vmul.f32 %v1272_v7, %v1270_v16  ;;  %v1515_v23 = vmul.f32 %v827_v14, %v1412_v6  ;;  %vm1056_vm9 = vcmp.eq.s32.totalorder %v1054_v18, 0  ;;  %v102_v41 = vadd.s32 4294967288, %v1474_v50 }
  0x39   :  { %168 = vadd.xlane.f32.xlu1 %v167_v24  ;;  %165 = vadd.xlane.f32.xlu0 %v164_v25  ;;  %v1067_v24 = vmul.f32 %v1275_v20, %v1274_v19  ;;  %v595_v37 = vsel %vm79_vm0, %v1485_v62, 0.0  ;;  %v601_v39 = vsel %vm79_vm0, %v1494_v13, 0.0  ;;  %vm118_vm11 = vcmask 1041409  }
  0x3a   :  { %v1520_v25 = vmul.f32 %v826_v22, %v1408_v4  ;;  %v1565_v43 = vsub.s32 %v102_v41, %v1472_v49  ;;  %vm121_vm12 = vcmask 123904   ;;  %vm769_vm14 = vcmask 130050  }
  0x3b   :  { %v1525_v29 = vmul.f32 %v1067_v24, %v1402_v1  ;;  %vm1009_vm15 = vcmask 130052   ;;  %vm492_vm1 = vcmask 1040384   ;;  %vm732_vm2 = vcmask 1041408  }
  0x3c   :  { %2026 = vst [vmem:[#allocation12_spill] sm:$0xff] %v1565_v43  ;;  %vm529_vm3 = vcmask 130049   ;;  %vm972_vm4 = vcmask 1043456   ;;  %vm556_vm5 = vcmask 121912   ;;  %vm569_vm6 = vcmask 115712  }
  0x3d   :  { %174 = vadd.xlane.f32.xlu1 %v173_v28  ;;  %171 = vadd.xlane.f32.xlu0 %v170_v30  ;;  %v1273_v28 = vsel %vm1056_vm9, 1.0, %v1360_v55  ;;  %v1530_v30 = vmul.f32 %v826_v22, %v1420_v10  ;;  %vm796_vm7 = vcmask 113712   ;;  %vm451_vm8 = vcmask 121856  }
  0x3e   :  { %v1066_v31 = vmul.f32 %v1275_v20, %v1273_v28  ;;  %vm1036_vm9 = vcmask 97312  }
  0x40   :  { %v1540_v35 = vmul.f32 %v1066_v31, %v1408_v4 }
  0x41   :  { %211 = vadd.xlane.f32.xlu1 %v210_v34  ;;  %208 = vadd.xlane.f32.xlu0 %v207_v36  ;;  %v1535_v34 = vmul.f32 %v1067_v24, %v1412_v6  ;;  %v1547_v36 = vmul.f32 %v1066_v31, %v1420_v10 }
  0x45   :  { %217 = vadd.xlane.f32.xlu1 %v216_v38  ;;  %214 = vadd.xlane.f32.xlu0 %v213_v40  ;;  %v592_v38 = vsel %vm79_vm0, %v1499_v15, 0.0  ;;  %v598_v40 = vsel %vm79_vm0, %v1510_v21, 0.0 }
  0x49   :  { %250 = vadd.xlane.f32.xlu1 %v249_v42  ;;  %247 = vadd.xlane.f32.xlu0 %v246_v44  ;;  %v1562_v42 = vsub.s32 %v1474_v50, %v1472_v49 }
  0x4b   :  { %2025 = vst [vmem:[#allocation11_spill] sm:$0xff] %v1562_v42 }
  0x4d   :  { %256 = vadd.xlane.f32.xlu1 %v255_v47  ;;  %253 = vadd.xlane.f32.xlu0 %v252_v48 }
  0x5e   :  { %417 = vrot.lane.b32.xlu1 %v1402_v1, %s1361_s0 }
  0x62   :  { %421 = vrot.lane.b32.xlu1 %v1412_v6, %s1361_s0 }
  0x63   :  { %415 = vrot.lane.b32.xlu0 %v1408_v4, %s1361_s0 }
  0x66   :  { %657 = vrot.lane.b32.xlu1 %v1485_v62, %s1362_s2 }
  0x67   :  { %419 = vrot.lane.b32.xlu0 %v1420_v10, %s1361_s0 }
  0x6a   :  { %661 = vrot.lane.b32.xlu1 %v1494_v13, %s1362_s2 }
  0x6b   :  { %655 = vrot.lane.b32.xlu0 %v1499_v15, %s1362_s2 }
  0x6e   :  { %897 = vrot.lane.b32.xlu1 %v1504_v17, %s1363_s28 }
  0x6f   :  { %659 = vrot.lane.b32.xlu0 %v1510_v21, %s1362_s2 }
  0x72   :  { %901 = vrot.lane.b32.xlu1 %v1515_v23, %s1363_s28 }
  0x73   :  { %895 = vrot.lane.b32.xlu0 %v1520_v25, %s1363_s28 }
  0x76   :  { %1137 = vrot.lane.b32.xlu1 %v1525_v29, %s1358_s18 }
  0x77   :  { %899 = vrot.lane.b32.xlu0 %v1530_v30, %s1363_s28 }
  0x7a   :  { %1141 = vrot.lane.b32.xlu1 %v1535_v34, %s1358_s18 }
  0x7b   :  { %1135 = vrot.lane.b32.xlu0 %v1540_v35, %s1358_s18 }
  0x7f   :  { %1139 = vrot.lane.b32.xlu0 %v1547_v36, %s1358_s18 }
  0x9e   :  { %596 = vadd.xlane.f32.xlu1 %v595_v37  ;;  %593 = vadd.xlane.f32.xlu0 %v592_v38 }
  0xa2   :  { %602 = vadd.xlane.f32.xlu1 %v601_v39  ;;  %599 = vadd.xlane.f32.xlu0 %v598_v40 }
  0xb2   :  { %v130_v44 = vpop.xlane.xlu1 %129  ;;  %v127_v45 = vpop.xlane.xlu0 %126 }
  0xb3   :  { %v148_v46 = vrot.slane %v130_v44, %v1565_v43  ;;  %v144_v47 = vrot.slane %v127_v45, %v1562_v42 }
  0xb5   :  { %v149_v55 = vsel %vm107_vm10, %v148_v46, %v144_v47 }
  0xb6   :  { %v136_v48 = vpop.xlane.xlu1 %135  ;;  %v133_v52 = vpop.xlane.xlu0 %132 }
  0xb7   :  { %v157_v51 = vrot.slane %v136_v48, %v1565_v43  ;;  %v153_v53 = vrot.slane %v133_v52, %v1562_v42 }
  0xb9   :  { %v158_v56 = vsel %vm107_vm10, %v157_v51, %v153_v53 }
  0xba   :  { %v88_v54 = vpop.xlane.xlu1 %87  ;;  %v82_v57 = vpop.xlane.xlu0 %81  ;;  %v159_v58 = vsel %vm118_vm11, %v158_v56, %v149_v55 }
  0xbb   :  { %v161_v59 = vsel %vm121_vm12, %v159_v58, 0.0 }
  0xbc   :  { %162 = vadd.xlane.f32.xlu1 %v161_v59 }
  0xbe   :  { %v91_v60 = vpop.xlane.xlu1 %90  ;;  %v85_v61 = vpop.xlane.xlu0 %84 }
  0xbf   :  { %v116_v52 = vrot.slane %v91_v60, %v1565_v43  ;;  %v106_v53 = vrot.slane %v85_v61, %v1565_v43 }
  0xc2   :  { %v169_v63 = vpop.xlane.xlu1 %168  ;;  %v166_v3 = vpop.xlane.xlu0 %165 }
  0xc3   :  { %v187_v7 = vrot.slane %v169_v63, %v1565_v43  ;;  %v183_v8 = vrot.slane %v166_v3, %v1562_v42  ;;  %v112_v3 = vrot.slane %v88_v54, %v1562_v42 }
  0xc5   :  { %v188_v19 = vsel %vm107_vm10, %v187_v7, %v183_v8  ;;  %v101_v7 = vrot.slane %v82_v57, %v1562_v42  ;;  %v832_v57 = vsel %vm79_vm0, %v1520_v25, 0.0 }
  0xc6   :  { %v175_v11 = vpop.xlane.xlu1 %174  ;;  %v172_v14 = vpop.xlane.xlu0 %171 }
  0xc7   :  { %v196_v12 = vrot.slane %v175_v11, %v1565_v43  ;;  %v192_v16 = vrot.slane %v172_v14, %v1562_v42  ;;  %v108_v61 = vsel %vm107_vm10, %v106_v53, %v101_v7 }
  0xc9   :  { %v197_v20 = vsel %vm107_vm10, %v196_v12, %v192_v16  ;;  %v117_v12 = vsel %vm107_vm10, %v116_v52, %v112_v3 }
  0xca   :  { %v212_v18 = vpop.xlane.xlu1 %211  ;;  %v209_v22 = vpop.xlane.xlu0 %208  ;;  %v198_v24 = vsel %vm118_vm11, %v197_v20, %v188_v19 }
  0xcb   :  { %v200_v28 = vsel %vm121_vm12, %v198_v24, 0.0  ;;  %v230_v31 = vrot.slane %v212_v18, %v1565_v43  ;;  %v226_v37 = vrot.slane %v209_v22, %v1562_v42  ;;  %v119_v18 = vsel %vm118_vm11, %v117_v12, %v108_v61 }
  0xcc   :  { %201 = vadd.xlane.f32.xlu0 %v200_v28  ;;  %v122_v54 = vsel %vm121_vm12, %v119_v18, 0.0 }
  0xcd   :  { %v231_v45 = vsel %vm107_vm10, %v230_v31, %v226_v37 }
  0xce   :  { %v218_v38 = vpop.xlane.xlu1 %217  ;;  %v215_v40 = vpop.xlane.xlu0 %214 }
  0xcf   :  { %v239_v39 = vrot.slane %v218_v38, %v1565_v43  ;;  %v235_v41 = vrot.slane %v215_v40, %v1562_v42 }
  0xd1   :  { %v240_v46 = vsel %vm107_vm10, %v239_v39, %v235_v41 }
  0xd2   :  { %v251_v44 = vpop.xlane.xlu1 %250  ;;  %v248_v47 = vpop.xlane.xlu0 %247  ;;  %v241_v48 = vsel %vm118_vm11, %v240_v46, %v231_v45 }
  0xd3   :  { %v243_v51 = vsel %vm121_vm12, %v241_v48, 0.0  ;;  %v269_v55 = vrot.slane %v251_v44, %v1565_v43  ;;  %v265_v56 = vrot.slane %v248_v47, %v1562_v42 }
  0xd4   :  { %244 = vadd.xlane.f32.xlu1 %v243_v51 }
  0xd5   :  { %v270_v11 = vsel %vm107_vm10, %v269_v55, %v265_v56 }
  0xd6   :  { %v257_v58 = vpop.xlane.xlu1 %256  ;;  %v254_v63 = vpop.xlane.xlu0 %253 }
  0xd7   :  { %v278_v59 = vrot.slane %v257_v58, %v1565_v43  ;;  %v274_v8 = vrot.slane %v254_v63, %v1562_v42 }
  0xd9   :  { %v279_v60 = vsel %vm107_vm10, %v278_v59, %v274_v8 }
  0xda   :  { %v280_v14 = vsel %vm118_vm11, %v279_v60, %v270_v11  ;;  %v1609_v19 = vpop.permute.xlu1 %417  ;;  %v1611_v20 = vpop.permute.xlu0 %415 }
  0xdb   :  { %v282_v16 = vsel %vm121_vm12, %v280_v14, 0.0 }
  0xdc   :  { %283 = vadd.xlane.f32.xlu0 %v282_v16 }
  0xde   :  { %v1613_v22 = vpop.permute.xlu1 %421  ;;  %v1615_v24 = vpop.permute.xlu0 %419 }
  0xe0   :  { %123 = vadd.xlane.f32.xlu0 %v122_v54 }
  0xe2   :  { %v1617_v28 = vpop.permute.xlu1 %657  ;;  %v1619_v31 = vpop.permute.xlu0 %655 }
  0xe4   :  { %833 = vadd.xlane.f32.xlu0 %v832_v57 }
  0xe6   :  { %v1621_v37 = vpop.permute.xlu1 %661  ;;  %v1623_v38 = vpop.permute.xlu0 %659 }
  0xea   :  { %v1625_v39 = vpop.permute.xlu1 %897  ;;  %v1627_v40 = vpop.permute.xlu0 %895 }
  0xee   :  { %v1629_v41 = vpop.permute.xlu1 %901  ;;  %v1631_v44 = vpop.permute.xlu0 %899 }
  0xf2   :  { %v1633_v45 = vpop.permute.xlu1 %1137  ;;  %v1635_v46 = vpop.permute.xlu0 %1135 }
  0xf6   :  { %v1637_v47 = vpop.permute.xlu1 %1141  ;;  %v1639_v48 = vpop.permute.xlu0 %1139 }
  0xf7   :  { %2027 = vst [vmem:[#allocation13_spill] sm:$0xff] %v1637_v47 }
 0x127   :  { %v597_v51 = vpop.xlane.xlu1 %596  ;;  %v594_v53 = vpop.xlane.xlu0 %593 }
 0x128   :  { %v615_v52 = vrot.slane %v597_v51, %v1565_v43  ;;  %v611_v55 = vrot.slane %v594_v53, %v1562_v42 }
 0x12a   :  { %v616_v58 = vsel %vm107_vm10, %v615_v52, %v611_v55 }
 0x12b   :  { %v603_v56 = vpop.xlane.xlu1 %602  ;;  %v600_v63 = vpop.xlane.xlu0 %599 }
 0x12c   :  { %v624_v59 = vrot.slane %v603_v56, %v1565_v43  ;;  %v620_v3 = vrot.slane %v600_v63, %v1562_v42 }
 0x12e   :  { %v625_v7 = vsel %vm107_vm10, %v624_v59, %v620_v3  ;;  %v306_v3 = vsub.s32 0, %v1472_v49 }
 0x12f   :  { %v1648_v8 = vsel %vm118_vm11, %v625_v7, %v616_v58  ;;  %v310_v7 = vsub.s32 1, %v1472_v49 }
 0x130   :  { %2028 = vst [vmem:[#allocation14_spill] sm:$0xff] %v1648_v8 }
 0x145   :  { %v163_v61 = vpop.xlane.xlu1 %162 }
 0x146   :  { %v286_v14 = vmul.f32 %v163_v61, %v163_v61  ;;  %v297_v51 = vsub.f32 0.0, %v163_v61 }
 0x155   :  { %v1650_v11 = vpop.xlane.xlu0 %201 }
 0x156   :  { %2029 = vst [vmem:[#allocation15_spill] sm:$0xff] %v1650_v11 }
 0x15d   :  { %v245_v57 = vpop.xlane.xlu1 %244 }
 0x15e   :  { %v292_v55 = vmul.f32 %v245_v57, %v1650_v11  ;;  %v298_v56 = vmul.f32 %v297_v51, %v245_v57 }
 0x165   :  { %v284_v60 = vpop.xlane.xlu0 %283 }
 0x166   :  { %v293_v52 = vmul.f32 %v284_v60, %v163_v61 }
 0x168   :  { %v294_v58 = vsub.f32 %v292_v55, %v293_v52 }
 0x169   :  { %v124_v12 = vpop.xlane.xlu0 %123 }
 0x16a   :  { %v285_v16 = vmul.f32 %v1650_v11, %v124_v12  ;;  %v299_v53 = vmul.f32 %v284_v60, %v124_v12 }
 0x16c   :  { %v287_v18 = vsub.f32 %v285_v16, %v286_v14  ;;  %v300_v59 = vadd.f32 %v299_v53, %v298_v56 }
 0x16e   :  { %vm288_vm13 = vcmp.ne.f32.partialorder %v287_v18, 0.0 }
 0x16f   :  { %v289_v54 = vsel %vm288_vm13, %v287_v18, 1.0 }
 0x170   :  { %1289 = vrcp.f32 %v289_v54 }
 0x17d   :  { %v1290_v63 = vpop.eup %1289 }
 0x17e   :  { %v295_v8 = vmul.f32 %v1290_v63, %v294_v58  ;;  %v301_v14 = vmul.f32 %v1290_v63, %v300_v59 }
 0x180   :  { %v296_v16 = vsel %vm288_vm13, %v295_v8, 0.0  ;;  %v302_v54 = vsel %vm288_vm13, %v301_v14, 0.0  ;;  %vm691_vm13 = vcmask 113664  }
 0x181   :  { %v307_v50 = vrot.slane %v296_v16, %v306_v3  ;;  %v311_v43 = vrot.slane %v296_v16, %v310_v7  ;;  %v322_v61 = vrot.slane %v302_v54, %v306_v3  ;;  %v326_v51 = vrot.slane %v302_v54, %v310_v7 }
 0x182   :  { %v2012_v54 = vrot.slane %v1510_v21, 6 }
 0x183   :  { %v314_v60 = vmul.f32 %v307_v50, %v1404_v2  ;;  %v315_v12 = vmul.f32 %v307_v50, %v1400_v0  ;;  %v316_v57 = vmul.f32 %v311_v43, %v1418_v9  ;;  %v317_v52 = vmul.f32 %v311_v43, %v1410_v5 }
 0x184   :  { %v1216_v50 = vmul.f32 %v1525_v29, %v1540_v35  ;;  %v2014_v43 = vrot.slane %v1499_v15, 6 }
 0x185   :  { %v329_v53 = vadd.f32 %v322_v61, %v314_v60  ;;  %v330_v55 = vadd.f32 %v322_v61, %v315_v12  ;;  %v331_v56 = vadd.f32 %v326_v51, %v316_v57  ;;  %v332_v18 = vadd.f32 %v326_v51, %v317_v52 }
 0x186   :  { %v2010_v61 = vrot.slane %v1520_v25, 4  ;;  %v761_v60 = vmul.f32 %v2014_v43, %v1499_v15 }
 0x187   :  { %v333_v58 = vsub.f32 %v329_v53, %v1442_v27  ;;  %v334_v8 = vsub.f32 %v330_v55, %v1440_v26  ;;  %v335_v59 = vsub.f32 %v331_v56, %v1452_v33  ;;  %v336_v2 = vsub.f32 %v332_v18, %v1450_v32 }
 0x188   :  { %v763_v55 = vmul.f32 %v2012_v54, %v1510_v21  ;;  %v1001_v56 = vmul.f32 %v2010_v61, %v1520_v25  ;;  %v512_v61 = vrot.slane %v1402_v1, 7 }
 0x189   :  { %v1667_v63 = vmul.f32 %v333_v58, %v1408_v4  ;;  %v1670_v0 = vmul.f32 %v334_v8, %v1402_v1  ;;  %v1678_v5 = vmul.f32 %v335_v59, %v1420_v10  ;;  %v1685_v9 = vmul.f32 %v336_v2, %v1412_v6 }
 0x18b   :  { %393 = vrot.lane.b32.xlu1 %v1670_v0, %s1361_s0  ;;  %391 = vrot.lane.b32.xlu0 %v1667_v63, %s1361_s0  ;;  %v342_v26 = vmul.f32 %v1670_v0, %v334_v8  ;;  %v1212_v27 = vsub.f32 %v1670_v0, %v1667_v63  ;;  %v2017_v32 = vrot.slane %v1667_v63, 6  ;;  %v344_v33 = vmul.f32 %v1685_v9, %v336_v2 }
 0x18c   :  { %v2013_v16 = vrot.slane %v1678_v5, 6  ;;  %v2011_v12 = vrot.slane %v1667_v63, 4  ;;  %v341_v8 = vmul.f32 %v1667_v63, %v333_v58  ;;  %v1213_v2 = vsub.f32 %v1685_v9, %v1678_v5 }
 0x18d   :  { %v348_v3 = vsel %vm79_vm0, %v342_v26, 0.0  ;;  %v1214_v7 = vand.u32 2147483647, %v1212_v27  ;;  %v743_v14 = vsub.f32 %v1667_v63, %v2017_v32  ;;  %v354_v57 = vsel %vm79_vm0, %v344_v33, 0.0 }
 0x18e   :  { %v745_v53 = vsub.f32 %v1678_v5, %v2013_v16  ;;  %v983_v18 = vsub.f32 %v1667_v63, %v2011_v12  ;;  %v2015_v26 = vrot.slane %v1530_v30, 4  ;;  %v1217_v58 = vmul.f32 %v1535_v34, %v1547_v36 }
 0x18f   :  { %395 = vrot.lane.b32.xlu1 %v1678_v5, %s1361_s0  ;;  %631 = vrot.lane.b32.xlu0 %v1667_v63, %s1362_s2  ;;  %v1218_v51 = vmul.f32 %v1216_v50, %v1214_v7  ;;  %v747_v52 = vand.u32 2147483647, %v743_v14  ;;  %v493_v7 = vrot.slane %v1667_v63, 7  ;;  %v494_v14 = vrot.slane %v1670_v0, 7 }
 0x190   :  { %v749_v50 = vand.u32 2147483647, %v745_v53  ;;  %v1003_v53 = vmul.f32 %v2015_v26, %v1530_v30  ;;  %v1215_v54 = vand.u32 2147483647, %v1213_v2  ;;  %v734_v2 = vrot.slane %v1670_v0, 6 }
 0x191   :  { %v1220_v27 = vsel %vm79_vm0, %v1218_v51, 0.0  ;;  %v765_v33 = vmul.f32 %v761_v60, %v747_v52  ;;  %v345_v60 = vsel %vm79_vm0, %v341_v8, 0.0  ;;  %v343_v51 = vmul.f32 %v1678_v5, %v335_v59 }
 0x192   :  { %v987_v52 = vand.u32 2147483647, %v983_v18  ;;  %v767_v12 = vmul.f32 %v763_v55, %v749_v50  ;;  %v503_v43 = vsub.f32 %v1667_v63, %v493_v7  ;;  %v495_v8 = vsel %vm492_vm1, %v493_v7, %v494_v14 }
 0x193   :  { %397 = vrot.lane.b32.xlu1 %v1685_v9, %s1361_s0  ;;  %635 = vrot.lane.b32.xlu0 %v1678_v5, %s1362_s2  ;;  %v496_v59 = vrot.slane %v1678_v5, 7  ;;  %v497_v18 = vrot.slane %v1685_v9, 7  ;;  %v514_v55 = vrot.slane %v1420_v10, 7  ;;  %v351_v50 = vsel %vm79_vm0, %v343_v51, 0.0 }
 0x194   :  { %v752_v7 = vrot.slane %v1485_v62, 6  ;;  %v776_v14 = vsel %vm769_vm14, %v767_v12, 0.0  ;;  %v1219_v11 = vmul.f32 %v1217_v58, %v1215_v54  ;;  %v2030_v42 = vrot.slane %v1667_v63, 6 }
 0x195   :  { %v498_v49 = vsel %vm492_vm1, %v496_v59, %v497_v18  ;;  %v737_v12 = vrot.slane %v1685_v9, 6  ;;  %v2031_v54 = vrot.slane %v1499_v15, 6  ;;  %v755_v58 = vrot.slane %v1494_v13, 6 }
 0x196   :  { %v735_v47 = vsel %vm732_vm2, %v2030_v42, %v734_v2  ;;  %v506_v18 = vsub.f32 %v1685_v9, %v498_v49  ;;  %v1223_v42 = vsel %vm79_vm0, %v1219_v11, 0.0  ;;  %v992_v49 = vrot.slane %v1504_v17, 4 }
 0x197   :  { %633 = vrot.lane.b32.xlu1 %v1670_v0, %s1362_s2  ;;  %871 = vrot.lane.b32.xlu0 %v1667_v63, %s1363_s28 }
 0x19b   :  { %637 = vrot.lane.b32.xlu1 %v1685_v9, %s1362_s2  ;;  %875 = vrot.lane.b32.xlu0 %v1678_v5, %s1363_s28 }
 0x19f   :  { %873 = vrot.lane.b32.xlu1 %v1670_v0, %s1363_s28  ;;  %1111 = vrot.lane.b32.xlu0 %v1667_v63, %s1358_s18 }
 0x1a3   :  { %877 = vrot.lane.b32.xlu1 %v1685_v9, %s1363_s28  ;;  %1115 = vrot.lane.b32.xlu0 %v1678_v5, %s1358_s18 }
 0x1a7   :  { %1113 = vrot.lane.b32.xlu1 %v1670_v0, %s1358_s18 }
 0x1ab   :  { %1117 = vrot.lane.b32.xlu1 %v1685_v9, %s1358_s18 }
 0x1c2   :  { %349 = vadd.xlane.f32.xlu0 %v348_v3  ;;  %v2016_v3 = vrot.slane %v1678_v5, 4 }
 0x1c4   :  { %v985_v16 = vsub.f32 %v1678_v5, %v2016_v3  ;;  %v1005_v3 = vmul.f32 %v1001_v56, %v987_v52 }
 0x1c6   :  { %355 = vadd.xlane.f32.xlu0 %v354_v57  ;;  %v511_v57 = vrot.slane %v1408_v4, 7  ;;  %v989_v32 = vand.u32 2147483647, %v985_v16  ;;  %v523_v16 = vmul.f32 %v514_v55, %v1420_v10  ;;  %v1010_v52 = vsel %vm1009_vm15, %v1005_v3, 0.0 }
 0x1c8   :  { %v521_v26 = vmul.f32 %v511_v57, %v1408_v4 }
 0x1ca   :  { %1221 = vadd.xlane.f32.xlu0 %v1220_v27  ;;  %v770_v27 = vsel %vm769_vm14, %v765_v33, 0.0  ;;  %v513_v33 = vsel %vm492_vm1, %v511_v57, %v512_v61  ;;  %v507_v61 = vand.u32 2147483647, %v503_v43  ;;  %v505_v57 = vsub.f32 %v1678_v5, %v496_v59 }
 0x1cb   :  { %v522_v51 = vmul.f32 %v513_v33, %v1402_v1  ;;  %v753_v43 = vsel %vm732_vm2, %v2031_v54, %v752_v7  ;;  %v974_v7 = vrot.slane %v1670_v0, 4  ;;  %vm931_vm14 = vcmask 97280  }
 0x1cc   :  { %v525_v33 = vmul.f32 %v521_v26, %v507_v61  ;;  %v509_v2 = vand.u32 2147483647, %v505_v57  ;;  %v762_v3 = vmul.f32 %v753_v43, %v1485_v62  ;;  %v977_v43 = vrot.slane %v1685_v9, 4 }
 0x1ce   :  { %771 = vadd.xlane.f32.xlu0 %v770_v27  ;;  %v515_v27 = vrot.slane %v1412_v6, 7  ;;  %v527_v61 = vmul.f32 %v523_v16, %v509_v2  ;;  %v2036_v2 = vrot.slane %v1678_v5, 4 }
 0x1cf   :  { %346 = vadd.xlane.f32.xlu1 %v345_v60  ;;  %v504_v60 = vsub.f32 %v1670_v0, %v495_v8  ;;  %v1007_v8 = vmul.f32 %v1003_v53, %v989_v32  ;;  %v510_v53 = vand.u32 2147483647, %v506_v18 }
 0x1d0   :  { %v516_v56 = vsel %vm492_vm1, %v514_v55, %v515_v27  ;;  %v2032_v55 = vrot.slane %v1678_v5, 6  ;;  %v536_v16 = vsel %vm529_vm3, %v527_v61, 0.0  ;;  %vm809_vm1 = vcmask 107520  }
 0x1d1   :  { %v508_v59 = vand.u32 2147483647, %v504_v60  ;;  %v524_v32 = vmul.f32 %v516_v56, %v1412_v6  ;;  %v1016_v11 = vsel %vm1009_vm15, %v1007_v8, 0.0  ;;  %v530_v60 = vsel %vm529_vm3, %v525_v33, 0.0 }
 0x1d2   :  { %777 = vadd.xlane.f32.xlu0 %v776_v14  ;;  %v738_v27 = vsel %vm732_vm2, %v2032_v55, %v737_v12  ;;  %v2034_v56 = vrot.slane %v1667_v63, 4  ;;  %v995_v55 = vrot.slane %v1515_v23, 4  ;;  %vm1171_vm15 = vcmask 64512  }
 0x1d3   :  { %352 = vadd.xlane.f32.xlu1 %v351_v50  ;;  %v744_v50 = vsub.f32 %v1670_v0, %v735_v47  ;;  %v526_v26 = vmul.f32 %v522_v51, %v508_v59  ;;  %v2033_v47 = vrot.slane %v1510_v21, 6  ;;  %v746_v12 = vsub.f32 %v1685_v9, %v738_v27 }
 0x1d4   :  { %v975_v54 = vsel %vm972_vm4, %v2034_v56, %v974_v7  ;;  %vm1243_vm3 = vcmask 7168  }
 0x1d5   :  { %v756_v14 = vsel %vm732_vm2, %v2033_v47, %v755_v58  ;;  %v748_v57 = vand.u32 2147483647, %v744_v50  ;;  %v533_v51 = vsel %vm79_vm0, %v526_v26, 0.0  ;;  %v2035_v58 = vrot.slane %v1520_v25, 4 }
 0x1d6   :  { %1011 = vadd.xlane.f32.xlu0 %v1010_v52  ;;  %v528_v52 = vmul.f32 %v524_v32, %v510_v53  ;;  %v764_v8 = vmul.f32 %v756_v14, %v1494_v13  ;;  %v984_v33 = vsub.f32 %v1670_v0, %v975_v54  ;;  %v978_v50 = vsel %vm972_vm4, %v2036_v2, %v977_v43  ;;  %v1833_v54 = vpop.xlane.xlu0 %833 }
 0x1d7   :  { %1224 = vadd.xlane.f32.xlu1 %v1223_v42  ;;  %v993_v59 = vsel %vm972_vm4, %v2035_v58, %v992_v49  ;;  %v766_v18 = vmul.f32 %v762_v3, %v748_v57  ;;  %v750_v42 = vand.u32 2147483647, %v746_v12  ;;  %v986_v3 = vsub.f32 %v1685_v9, %v978_v50 }
 0x1d8   :  { %v539_v27 = vsel %vm79_vm0, %v528_v52, 0.0  ;;  %v1002_v7 = vmul.f32 %v993_v59, %v1504_v17  ;;  %v2037_v26 = vrot.slane %v1530_v30, 4  ;;  %v427_v58 = vmul.f32 %v1611_v20, %v1408_v4 }
 0x1d9   :  { %v773_v32 = vsel %vm79_vm0, %v766_v18, 0.0  ;;  %v768_v49 = vmul.f32 %v764_v8, %v750_v42  ;;  %v428_v59 = vmul.f32 %v1609_v19, %v1402_v1  ;;  %vm1238_vm2 = vcmask 58368  }
 0x1da   :  { %1017 = vadd.xlane.f32.xlu0 %v1016_v11  ;;  %v988_v11 = vand.u32 2147483647, %v984_v33  ;;  %v996_v53 = vsel %vm972_vm4, %v2037_v26, %v995_v55  ;;  %v667_v26 = vmul.f32 %v1619_v31, %v1499_v15  ;;  %vm1245_vm4 = vcmask 15360  }
 0x1db   :  { %531 = vadd.xlane.f32.xlu1 %v530_v60  ;;  %v779_v47 = vsel %vm79_vm0, %v768_v49, 0.0  ;;  %v990_v60 = vand.u32 2147483647, %v986_v3  ;;  %v1004_v61 = vmul.f32 %v996_v53, %v1515_v23  ;;  %v430_v3 = vmul.f32 %v1613_v22, %v1412_v6 }
 0x1dc   :  { %v1006_v14 = vmul.f32 %v1002_v7, %v988_v11  ;;  %v429_v7 = vmul.f32 %v1615_v24, %v1420_v10  ;;  %v668_v6 = vmul.f32 %v1617_v28, %v1485_v62 }
 0x1dd   :  { %v1008_v12 = vmul.f32 %v1004_v61, %v990_v60 }
 0x1de   :  { %534 = vadd.xlane.f32.xlu0 %v533_v51  ;;  %v1013_v57 = vsel %vm79_vm0, %v1006_v14, 0.0 }
 0x1df   :  { %537 = vadd.xlane.f32.xlu1 %v536_v16  ;;  %v1019_v56 = vsel %vm79_vm0, %v1008_v12, 0.0  ;;  %v669_v12 = vmul.f32 %v1623_v38, %v1510_v21  ;;  %v907_v21 = vmul.f32 %v1627_v40, %v1520_v25 }
 0x1e2   :  { %540 = vadd.xlane.f32.xlu0 %v539_v27 }
 0x1e3   :  { %774 = vadd.xlane.f32.xlu1 %v773_v32 }
 0x1e7   :  { %780 = vadd.xlane.f32.xlu1 %v779_v47 }
 0x1eb   :  { %1014 = vadd.xlane.f32.xlu1 %v1013_v57 }
 0x1ef   :  { %1020 = vadd.xlane.f32.xlu1 %v1019_v56 }
 0x1fd   :  { %v394_v43 = vpop.permute.xlu1 %393  ;;  %v392_v51 = vpop.permute.xlu0 %391 }
 0x1fe   :  { %v404_v52 = vsub.f32 %v1670_v0, %v394_v43  ;;  %v403_v8 = vsub.f32 %v1667_v63, %v392_v51 }
 0x200   :  { %v408_v16 = vand.u32 2147483647, %v404_v52  ;;  %v407_v18 = vand.u32 2147483647, %v403_v8 }
 0x201   :  { %v396_v42 = vpop.permute.xlu1 %395  ;;  %v632_v33 = vpop.permute.xlu0 %631 }
 0x202   :  { %v432_v2 = vmul.f32 %v428_v59, %v408_v16  ;;  %v431_v50 = vmul.f32 %v427_v58, %v407_v18  ;;  %v405_v55 = vsub.f32 %v1678_v5, %v396_v42  ;;  %v643_v27 = vsub.f32 %v1667_v63, %v632_v33 }
 0x203   :  { %v670_v58 = vmul.f32 %v1621_v37, %v1494_v13  ;;  %v908_v13 = vmul.f32 %v1625_v39, %v1504_v17 }
 0x204   :  { %v409_v32 = vand.u32 2147483647, %v405_v55  ;;  %441 = vrot.lane.b32.xlu1 %v432_v2, %s1364_s29  ;;  %439 = vrot.lane.b32.xlu0 %v431_v50, %s1364_s29  ;;  %v647_v19 = vand.u32 2147483647, %v643_v27  ;;  %v909_v2 = vmul.f32 %v1631_v44, %v1530_v30  ;;  %v1147_v44 = vmul.f32 %v1635_v46, %v1540_v35 }
 0x205   :  { %v398_v4 = vpop.permute.xlu1 %397  ;;  %v636_v20 = vpop.permute.xlu0 %635 }
 0x206   :  { %v433_v1 = vmul.f32 %v429_v7, %v409_v32  ;;  %v406_v49 = vsub.f32 %v1685_v9, %v398_v4  ;;  %v645_v11 = vsub.f32 %v1678_v5, %v636_v20  ;;  %v671_v14 = vmul.f32 %v667_v26, %v647_v19 }
 0x208   :  { %v410_v53 = vand.u32 2147483647, %v406_v49  ;;  %443 = vrot.lane.b32.xlu0 %v433_v1, %s1364_s29  ;;  %v649_v10 = vand.u32 2147483647, %v645_v11  ;;  %v1148_v11 = vmul.f32 %v1633_v45, %v1525_v29  ;;  %v838_v45 = vsel %vm79_vm0, %v1530_v30, 0.0 }
 0x209   :  { %v634_v24 = vpop.permute.xlu1 %633  ;;  %v872_v47 = vpop.permute.xlu0 %871 }
 0x20a   :  { %v434_v60 = vmul.f32 %v430_v3, %v410_v53  ;;  %v644_v61 = vsub.f32 %v1670_v0, %v634_v24  ;;  %v883_v57 = vsub.f32 %v1667_v63, %v872_v47  ;;  %v673_v15 = vmul.f32 %v669_v12, %v649_v10  ;;  %v2038_v10 = vld [vmem:[#allocation13_spill] sm:$0xff] }
 0x20b   :  { %v1150_v24 = vmul.f32 %v2038_v10, %v1535_v34 }
 0x20c   :  { %v648_v22 = vand.u32 2147483647, %v644_v61  ;;  %445 = vrot.lane.b32.xlu1 %v434_v60, %s1364_s29  ;;  %679 = vrot.lane.b32.xlu0 %v671_v14, %s1365_s30  ;;  %v887_v51 = vand.u32 2147483647, %v883_v57  ;;  %v841_v14 = vsel %vm79_vm0, %v1515_v23, 0.0 }
 0x20d   :  { %v638_v31 = vpop.permute.xlu1 %637  ;;  %v876_v56 = vpop.permute.xlu0 %875 }
 0x20e   :  { %v672_v43 = vmul.f32 %v668_v6, %v648_v22  ;;  %v646_v52 = vsub.f32 %v1685_v9, %v638_v31  ;;  %v885_v8 = vsub.f32 %v1678_v5, %v876_v56  ;;  %v911_v16 = vmul.f32 %v907_v21, %v887_v51  ;;  %v2039_v6 = vld [vmem:[#allocation11_spill] sm:$0xff]  ;;  %v2040_v56 = vld [vmem:[#allocation12_spill] sm:$0xff] }
 0x210   :  { %v650_v62 = vand.u32 2147483647, %v646_v52  ;;  %681 = vrot.lane.b32.xlu1 %v672_v43, %s1365_s30  ;;  %683 = vrot.lane.b32.xlu0 %v673_v15, %s1365_s30  ;;  %v889_v28 = vand.u32 2147483647, %v885_v8 }
 0x211   :  { %v874_v38 = vpop.permute.xlu1 %873  ;;  %v1112_v59 = vpop.permute.xlu0 %1111 }
 0x212   :  { %v674_v18 = vmul.f32 %v670_v58, %v650_v62  ;;  %v884_v42 = vsub.f32 %v1670_v0, %v874_v38  ;;  %v1123_v33 = vsub.f32 %v1667_v63, %v1112_v59  ;;  %v913_v25 = vmul.f32 %v909_v2, %v889_v28  ;;  %v2041_v38 = vld [vmem:[#allocation10_spill] sm:$0xff]  ;;  %v2042_v2 = vld [vmem:[#allocation9_spill] sm:$0xff] }
 0x213   :  { %v910_v63 = vmul.f32 %v1629_v41, %v1515_v23  ;;  %v551_v59 = vadd.s32 4294967289, %v2041_v38 }
 0x214   :  { %v888_v37 = vand.u32 2147483647, %v884_v42  ;;  %685 = vrot.lane.b32.xlu1 %v674_v18, %s1365_s30  ;;  %919 = vrot.lane.b32.xlu0 %v911_v16, %s1366_s4  ;;  %v1127_v27 = vand.u32 2147483647, %v1123_v33  ;;  %v546_v42 = vadd.s32 1, %v2041_v38 }
 0x215   :  { %v878_v40 = vpop.permute.xlu1 %877  ;;  %v1116_v50 = vpop.permute.xlu0 %1115 }
 0x216   :  { %v912_v55 = vmul.f32 %v908_v13, %v888_v37  ;;  %v886_v7 = vsub.f32 %v1685_v9, %v878_v40  ;;  %v1125_v32 = vsub.f32 %v1678_v5, %v1116_v50  ;;  %v1151_v20 = vmul.f32 %v1147_v44, %v1127_v27 }
 0x217   :  { %v1149_v5 = vmul.f32 %v1639_v48, %v1547_v36  ;;  %v835_v48 = vsel %vm79_vm0, %v1504_v17, 0.0  ;;  %v554_v13 = vsub.s32 %v551_v59, %v2042_v2  ;;  %v549_v40 = vsub.s32 %v546_v42, %v2042_v2 }
 0x218   :  { %v890_v39 = vand.u32 2147483647, %v886_v7  ;;  %921 = vrot.lane.b32.xlu1 %v912_v55, %s1366_s4  ;;  %923 = vrot.lane.b32.xlu0 %v913_v25, %s1366_s4  ;;  %v1129_v19 = vand.u32 2147483647, %v1125_v32  ;;  %v791_v25 = vadd.s32 4294967290, %v2041_v38  ;;  %v786_v55 = vadd.s32 2, %v2041_v38 }
 0x219   :  { %v1114_v4 = vpop.permute.xlu1 %1113 }
 0x21a   :  { %v914_v1 = vmul.f32 %v910_v63, %v890_v39  ;;  %v1124_v49 = vsub.f32 %v1670_v0, %v1114_v4  ;;  %v1153_v46 = vmul.f32 %v1149_v5, %v1129_v19  ;;  %v794_v32 = vsub.s32 %v791_v25, %v2042_v2 }
 0x21b   :  { %v1026_v63 = vadd.s32 4, %v2041_v38  ;;  %v1031_v19 = vadd.s32 4294967292, %v2041_v38 }
 0x21c   :  { %v1128_v3 = vand.u32 2147483647, %v1124_v49  ;;  %925 = vrot.lane.b32.xlu1 %v914_v1, %s1366_s4  ;;  %1159 = vrot.lane.b32.xlu0 %v1151_v20, %s1367_s5  ;;  %v789_v1 = vsub.s32 %v786_v55, %v2042_v2 }
 0x21d   :  { %v1118_v41 = vpop.permute.xlu1 %1117 }
 0x21e   :  { %v1152_v26 = vmul.f32 %v1148_v11, %v1128_v3  ;;  %v1126_v53 = vsub.f32 %v1685_v9, %v1118_v41  ;;  %v1029_v41 = vsub.s32 %v1026_v63, %v2042_v2 }
 0x220   :  { %v1130_v47 = vand.u32 2147483647, %v1126_v53  ;;  %1161 = vrot.lane.b32.xlu1 %v1152_v26, %s1367_s5  ;;  %1163 = vrot.lane.b32.xlu0 %v1153_v46, %s1367_s5 }
 0x222   :  { %v1154_v0 = vmul.f32 %v1150_v24, %v1130_v47  ;;  %v1034_v47 = vsub.s32 %v1031_v19, %v2042_v2  ;;  %v1075_v19 = vsel %vm79_vm0, %v1525_v29, 0.0 }
 0x224   :  { %1165 = vrot.lane.b32.xlu1 %v1154_v0, %s1367_s5 }
 0x23f   :  { %839 = vadd.xlane.f32.xlu0 %v838_v45 }
 0x248   :  { %836 = vadd.xlane.f32.xlu1 %v835_v48 }
 0x24b   :  { %v350_v9 = vpop.xlane.xlu0 %349 }
 0x24c   :  { %842 = vadd.xlane.f32.xlu1 %v841_v14  ;;  %v368_v30 = vrot.slane %v350_v9, %v2040_v56 }
 0x24f   :  { %v356_v60 = vpop.xlane.xlu0 %355 }
 0x250   :  { %v377_v43 = vrot.slane %v356_v60, %v2040_v56 }
 0x253   :  { %v1222_v61 = vpop.xlane.xlu0 %1221 }
 0x254   :  { %v1231_v21 = vrot.slane %v1222_v61, %v2039_v6 }
 0x257   :  { %v772_v57 = vpop.xlane.xlu0 %771 }
 0x258   :  { %v347_v12 = vpop.xlane.xlu1 %346  ;;  %v790_v53 = vrot.slane %v772_v57, %v789_v1 }
 0x259   :  { %v364_v22 = vrot.slane %v347_v12, %v2039_v6 }
 0x25b   :  { %v778_v15 = vpop.xlane.xlu0 %777  ;;  %v369_v52 = vsel %vm107_vm10, %v368_v30, %v364_v22 }
 0x25c   :  { %v353_v31 = vpop.xlane.xlu1 %352  ;;  %v801_v10 = vrot.slane %v778_v15, %v789_v1 }
 0x25d   :  { %v373_v17 = vrot.slane %v353_v31, %v2039_v6 }
 0x25f   :  { %v1012_v51 = vpop.xlane.xlu0 %1011  ;;  %v378_v23 = vsel %vm107_vm10, %v377_v43, %v373_v17 }
 0x260   :  { %v1225_v8 = vpop.xlane.xlu1 %1224  ;;  %v379_v58 = vsel %vm118_vm11, %v378_v23, %v369_v52  ;;  %v1030_v9 = vrot.slane %v1012_v51, %v1029_v41 }
 0x261   :  { %v1235_v62 = vrot.slane %v1225_v8, %v2039_v6  ;;  %v381_v28 = vsel %vm121_vm12, %v379_v58, 0.0 }
 0x262   :  { %382 = vadd.xlane.f32.xlu1 %v381_v28 }
 0x263   :  { %v1018_v16 = vpop.xlane.xlu0 %1017  ;;  %v1901_v18 = vsel %vm118_vm11, %v1235_v62, %v1231_v21 }
 0x264   :  { %v532_v33 = vpop.xlane.xlu1 %531  ;;  %v1041_v15 = vrot.slane %v1018_v16, %v1029_v41 }
 0x265   :  { %v550_v44 = vrot.slane %v532_v33, %v549_v40 }
 0x267   :  { %v535_v37 = vpop.xlane.xlu0 %534 }
 0x268   :  { %v538_v50 = vpop.xlane.xlu1 %537  ;;  %v555_v27 = vrot.slane %v535_v37, %v554_v13 }
 0x269   :  { %v561_v39 = vrot.slane %v538_v50, %v549_v40 }
 0x26a   :  { %v557_v49 = vsel %vm556_vm5, %v555_v27, %v550_v44 }
 0x26b   :  { %v541_v7 = vpop.xlane.xlu0 %540 }
 0x26c   :  { %v565_v4 = vrot.slane %v541_v7, %v554_v13  ;;  %v775_v20 = vpop.xlane.xlu1 %774 }
 0x26d   :  { %v795_v5 = vrot.slane %v775_v20, %v794_v32 }
 0x26e   :  { %v566_v11 = vsel %vm556_vm5, %v565_v4, %v561_v39  ;;  %vm1247_vm5 = vcmask 23552  }
 0x26f   :  { %v567_v3 = vsel %vm118_vm11, %v566_v11, %v557_v49  ;;  %v797_v0 = vsel %vm796_vm7, %v795_v5, %v790_v53  ;;  %v1072_v49 = vsel %vm79_vm0, %v1540_v35, 0.0  ;;  %v1081_v11 = vsel %vm79_vm0, %v1535_v34, 0.0 }
 0x270   :  { %v781_v46 = vpop.xlane.xlu1 %780  ;;  %v570_v26 = vsel %vm569_vm6, %v567_v3, 0.0  ;;  %v1078_v5 = vsel %vm79_vm0, %v1547_v36, 0.0  ;;  %v2043_v3 = vld [vmem:[#allocation14_spill] sm:$0xff]  ;;  %v851_v36 = vrot.slane %v1833_v54, %v2039_v6  ;;  %vm1049_vm0 = vcmask 91136  }
 0x271   :  { %v805_v24 = vrot.slane %v781_v46, %v794_v32  ;;  %571 = vadd.xlane.f32.xlu1 %v570_v26  ;;  %v628_v41 = vsel %vm121_vm12, %v2043_v3, 0.0  ;;  %vm1255_vm6 = vcmask 56320  }
 0x273   :  { %v806_v45 = vsel %vm796_vm7, %v805_v24, %v801_v10  ;;  %vm1258_vm7 = vcmask 72704  }
 0x274   :  { %v1015_v48 = vpop.xlane.xlu1 %1014  ;;  %v1916_v14 = vsel %vm118_vm11, %v806_v45, %v797_v0 }
 0x275   :  { %v1035_v60 = vrot.slane %v1015_v48, %v1034_v47  ;;  %v810_v29 = vsel %vm809_vm1, %v1916_v14, 0.0 }
 0x276   :  { %v440_v61 = vpop.permute.xlu0 %439 }
 0x277   :  { %v452_v12 = vsel %vm451_vm8, %v440_v61, 0.0  ;;  %v1037_v22 = vsel %vm1036_vm9, %v1035_v60, %v1030_v9 }
 0x278   :  { %v1021_v57 = vpop.xlane.xlu1 %1020  ;;  %453 = vadd.xlane.f32.xlu0 %v452_v12 }
 0x279   :  { %v1045_v31 = vrot.slane %v1021_v57, %v1034_v47 }
 0x27a   :  { %v444_v30 = vpop.permute.xlu0 %443 }
 0x27b   :  { %v458_v43 = vsel %vm451_vm8, %v444_v30, 0.0  ;;  %v1046_v17 = vsel %vm1036_vm9, %v1045_v31, %v1041_v15 }
 0x27c   :  { %v442_v52 = vpop.permute.xlu1 %441  ;;  %459 = vadd.xlane.f32.xlu0 %v458_v43  ;;  %v1921_v23 = vsel %vm118_vm11, %v1046_v17, %v1037_v22 }
 0x27d   :  { %v455_v51 = vsel %vm451_vm8, %v442_v52, 0.0  ;;  %v1050_v48 = vsel %vm1049_vm0, %v1921_v23, 0.0 }
 0x27e   :  { %456 = vadd.xlane.f32.xlu1 %v455_v51  ;;  %v680_v8 = vpop.permute.xlu0 %679 }
 0x27f   :  { %v692_v38 = vsel %vm691_vm13, %v680_v8, 0.0 }
 0x280   :  { %v446_v58 = vpop.permute.xlu1 %445 }
 0x281   :  { %v461_v21 = vsel %vm451_vm8, %v446_v58, 0.0 }
 0x282   :  { %462 = vadd.xlane.f32.xlu0 %v461_v21  ;;  %v684_v62 = vpop.permute.xlu0 %683 }
 0x283   :  { %v698_v33 = vsel %vm691_vm13, %v684_v62, 0.0 }
 0x284   :  { %v682_v28 = vpop.permute.xlu1 %681 }
 0x285   :  { %v695_v59 = vsel %vm691_vm13, %v682_v28, 0.0 }
 0x286   :  { %696 = vadd.xlane.f32.xlu1 %v695_v59  ;;  %693 = vadd.xlane.f32.xlu0 %v692_v38  ;;  %v920_v16 = vpop.permute.xlu0 %919 }
 0x287   :  { %v932_v25 = vsel %vm931_vm14, %v920_v16, 0.0 }
 0x288   :  { %v686_v42 = vpop.permute.xlu1 %685 }
 0x289   :  { %v701_v2 = vsel %vm691_vm13, %v686_v42, 0.0 }
 0x28a   :  { %702 = vadd.xlane.f32.xlu1 %v701_v2  ;;  %699 = vadd.xlane.f32.xlu0 %v698_v33  ;;  %v924_v13 = vpop.permute.xlu0 %923 }
 0x28b   :  { %v938_v27 = vsel %vm931_vm14, %v924_v13, 0.0 }
 0x28c   :  { %v922_v37 = vpop.permute.xlu1 %921 }
 0x28d   :  { %v935_v40 = vsel %vm931_vm14, %v922_v37, 0.0 }
 0x28e   :  { %936 = vadd.xlane.f32.xlu1 %v935_v40  ;;  %933 = vadd.xlane.f32.xlu0 %v932_v25  ;;  %v1160_v50 = vpop.permute.xlu0 %1159 }
 0x28f   :  { %v1172_v63 = vsel %vm1171_vm15, %v1160_v50, 0.0 }
 0x290   :  { %v926_v55 = vpop.permute.xlu1 %925 }
 0x291   :  { %v941_v7 = vsel %vm931_vm14, %v926_v55, 0.0 }
 0x292   :  { %942 = vadd.xlane.f32.xlu1 %v941_v7  ;;  %939 = vadd.xlane.f32.xlu0 %v938_v27  ;;  %v1164_v39 = vpop.permute.xlu0 %1163  ;;  %v1239_v7 = vsel %vm1238_vm2, %v1901_v18, 0.0 }
 0x293   :  { %v1178_v20 = vsel %vm1171_vm15, %v1164_v39, 0.0 }
 0x294   :  { %v1162_v32 = vpop.permute.xlu1 %1161 }
 0x295   :  { %v1175_v44 = vsel %vm1171_vm15, %v1162_v32, 0.0 }
 0x296   :  { %1176 = vadd.xlane.f32.xlu1 %v1175_v44  ;;  %1173 = vadd.xlane.f32.xlu0 %v1172_v63 }
 0x298   :  { %v1166_v4 = vpop.permute.xlu1 %1165 }
 0x299   :  { %v1181_v1 = vsel %vm1171_vm15, %v1166_v4, 0.0 }
 0x29a   :  { %1182 = vadd.xlane.f32.xlu1 %v1181_v1  ;;  %1179 = vadd.xlane.f32.xlu0 %v1178_v20 }
 0x29e   :  { %1076 = vadd.xlane.f32.xlu1 %v1075_v19  ;;  %1073 = vadd.xlane.f32.xlu0 %v1072_v49 }
 0x2a2   :  { %1082 = vadd.xlane.f32.xlu1 %v1081_v11  ;;  %1079 = vadd.xlane.f32.xlu0 %v1078_v5 }
 0x2a6   :  { %629 = vadd.xlane.f32.xlu0 %v628_v41 }
 0x2aa   :  { %811 = vadd.xlane.f32.xlu0 %v810_v29 }
 0x2c8   :  { %v840_v35 = vpop.xlane.xlu0 %839 }
 0x2c9   :  { %v860_v53 = vrot.slane %v840_v35, %v2039_v6 }
 0x2d1   :  { %v837_v46 = vpop.xlane.xlu1 %836 }
 0x2d2   :  { %v855_v26 = vrot.slane %v837_v46, %v2040_v56 }
 0x2d4   :  { %v856_v24 = vsel %vm107_vm10, %v855_v26, %v851_v36 }
 0x2d5   :  { %v843_v34 = vpop.xlane.xlu1 %842 }
 0x2d6   :  { %v864_v10 = vrot.slane %v843_v34, %v2040_v56 }
 0x2d8   :  { %v865_v47 = vsel %vm107_vm10, %v864_v10, %v860_v53 }
 0x2d9   :  { %v866_v0 = vsel %vm118_vm11, %v865_v47, %v856_v24 }
 0x2da   :  { %v868_v45 = vsel %vm121_vm12, %v866_v0, 0.0 }
 0x2db   :  { %869 = vadd.xlane.f32.xlu1 %v868_v45 }
 0x2df   :  { %1051 = vadd.xlane.f32.xlu1 %v1050_v48 }
 0x2eb   :  { %v1950_v14 = vpop.xlane.xlu1 %382 }
 0x2fa   :  { %v1952_v60 = vpop.xlane.xlu1 %571 }
 0x301   :  { %v454_v9 = vpop.xlane.xlu0 %453 }
 0x302   :  { %v471_v57 = vrot.slane %v454_v9, %v2039_v6 }
 0x305   :  { %v460_v54 = vpop.xlane.xlu0 %459 }
 0x306   :  { %v480_v15 = vrot.slane %v460_v54, %v2039_v6 }
 0x307   :  { %v457_v61 = vpop.xlane.xlu1 %456 }
 0x308   :  { %v475_v12 = vrot.slane %v457_v61, %v2040_v56 }
 0x30a   :  { %v476_v30 = vsel %vm107_vm10, %v475_v12, %v471_v57 }
 0x30b   :  { %v463_v22 = vpop.xlane.xlu0 %462 }
 0x30c   :  { %v484_v31 = vrot.slane %v463_v22, %v2040_v56 }
 0x30e   :  { %v485_v43 = vsel %vm107_vm10, %v484_v31, %v480_v15 }
 0x30f   :  { %v697_v17 = vpop.xlane.xlu1 %696  ;;  %v694_v52 = vpop.xlane.xlu0 %693  ;;  %v486_v23 = vsel %vm118_vm11, %v485_v43, %v476_v30 }
 0x310   :  { %v488_v51 = vsel %vm121_vm12, %v486_v23, 0.0  ;;  %v715_v8 = vrot.slane %v697_v17, %v2040_v56  ;;  %v711_v58 = vrot.slane %v694_v52, %v2039_v6 }
 0x311   :  { %489 = vadd.xlane.f32.xlu0 %v488_v51 }
 0x312   :  { %v716_v59 = vsel %vm107_vm10, %v715_v8, %v711_v58 }
 0x313   :  { %v703_v21 = vpop.xlane.xlu1 %702  ;;  %v700_v62 = vpop.xlane.xlu0 %699 }
 0x314   :  { %v724_v28 = vrot.slane %v703_v21, %v2040_v56  ;;  %v720_v38 = vrot.slane %v700_v62, %v2039_v6  ;;  %v2044_v21 = vld [vmem:[#allocation15_spill] sm:$0xff] }
 0x316   :  { %v725_v16 = vsel %vm107_vm10, %v724_v28, %v720_v38 }
 0x317   :  { %v937_v42 = vpop.xlane.xlu1 %936  ;;  %v934_v33 = vpop.xlane.xlu0 %933  ;;  %v726_v2 = vsel %vm118_vm11, %v725_v16, %v716_v59 }
 0x318   :  { %v728_v13 = vsel %vm121_vm12, %v726_v2, 0.0  ;;  %v955_v37 = vrot.slane %v937_v42, %v2040_v56  ;;  %v951_v25 = vrot.slane %v934_v33, %v2039_v6 }
 0x319   :  { %729 = vadd.xlane.f32.xlu1 %v728_v13 }
 0x31a   :  { %v956_v32 = vsel %vm107_vm10, %v955_v37, %v951_v25 }
 0x31b   :  { %v943_v40 = vpop.xlane.xlu1 %942  ;;  %v940_v50 = vpop.xlane.xlu0 %939 }
 0x31c   :  { %v964_v55 = vrot.slane %v943_v40, %v2040_v56  ;;  %v960_v27 = vrot.slane %v940_v50, %v2039_v6 }
 0x31d   :  { %1240 = vadd.xlane.f32.xlu1 %v1239_v7 }
 0x31e   :  { %v965_v63 = vsel %vm107_vm10, %v964_v55, %v960_v27 }
 0x31f   :  { %v1177_v44 = vpop.xlane.xlu1 %1176  ;;  %v1174_v39 = vpop.xlane.xlu0 %1173  ;;  %v966_v4 = vsel %vm118_vm11, %v965_v63, %v956_v32 }
 0x320   :  { %v968_v20 = vsel %vm121_vm12, %v966_v4, 0.0  ;;  %v1195_v1 = vrot.slane %v1177_v44, %v2040_v56  ;;  %v1191_v19 = vrot.slane %v1174_v39, %v2039_v6 }
 0x321   :  { %969 = vadd.xlane.f32.xlu0 %v968_v20 }
 0x322   :  { %v1196_v3 = vsel %vm107_vm10, %v1195_v1, %v1191_v19 }
 0x323   :  { %v1183_v49 = vpop.xlane.xlu1 %1182  ;;  %v1180_v11 = vpop.xlane.xlu0 %1179 }
 0x324   :  { %v1204_v18 = vrot.slane %v1183_v49, %v2040_v56  ;;  %v1200_v5 = vrot.slane %v1180_v11, %v2039_v6 }
 0x326   :  { %v1205_v41 = vsel %vm107_vm10, %v1204_v18, %v1200_v5 }
 0x327   :  { %v1077_v29 = vpop.xlane.xlu1 %1076  ;;  %v1074_v46 = vpop.xlane.xlu0 %1073  ;;  %v1206_v35 = vsel %vm118_vm11, %v1205_v41, %v1196_v3 }
 0x328   :  { %v1208_v26 = vsel %vm121_vm12, %v1206_v35, 0.0  ;;  %v1095_v53 = vrot.slane %v1077_v29, %v2040_v56  ;;  %v1091_v34 = vrot.slane %v1074_v46, %v2039_v6 }
 0x329   :  { %1209 = vadd.xlane.f32.xlu0 %v1208_v26 }
 0x32a   :  { %v1096_v0 = vsel %vm107_vm10, %v1095_v53, %v1091_v34 }
 0x32b   :  { %v1083_v36 = vpop.xlane.xlu1 %1082  ;;  %v1080_v10 = vpop.xlane.xlu0 %1079 }
 0x32c   :  { %v1104_v24 = vrot.slane %v1083_v36, %v2040_v56  ;;  %v1100_v47 = vrot.slane %v1080_v10, %v2039_v6 }
 0x32e   :  { %v1105_v45 = vsel %vm107_vm10, %v1104_v24, %v1100_v47  ;;  %vm1249_vm10 = vcmask 31744  }
 0x32f   :  { %v1106_v48 = vsel %vm118_vm11, %v1105_v45, %v1096_v0  ;;  %v630_v54 = vpop.xlane.xlu0 %629  ;;  %vm1251_vm11 = vcmask 39936  }
 0x330   :  { %v1108_v9 = vsel %vm121_vm12, %v1106_v48, 0.0  ;;  %vm1253_vm12 = vcmask 48128  }
 0x331   :  { %1109 = vadd.xlane.f32.xlu0 %v1108_v9 }
 0x333   :  { %v812_v12 = vpop.xlane.xlu0 %811 }
 0x364   :  { %v870_v61 = vpop.xlane.xlu1 %869 }
 0x368   :  { %v1052_v22 = vpop.xlane.xlu1 %1051 }
 0x39a   :  { %v490_v57 = vpop.xlane.xlu0 %489 }
 0x39b   :  { %v573_v56 = vadd.f32 %v1952_v60, %v490_v57 }
 0x39d   :  { %v1244_v43 = vsel %vm1243_vm3, %v1950_v14, %v573_v56 }
 0x3a2   :  { %v730_v15 = vpop.xlane.xlu1 %729 }
 0x3a3   :  { %v813_v6 = vadd.f32 %v812_v12, %v730_v15 }
 0x3a5   :  { %v1246_v23 = vsel %vm1245_vm4, %v1244_v43, %v813_v6 }
 0x3a6   :  { %v1241_v17 = vpop.xlane.xlu1 %1240 }
 0x3aa   :  { %v970_v31 = vpop.xlane.xlu0 %969 }
 0x3ab   :  { %v1053_v30 = vadd.f32 %v1052_v22, %v970_v31 }
 0x3ad   :  { %v1248_v8 = vsel %vm1247_vm5, %v1246_v23, %v1053_v30 }
 0x3b2   :  { %v1210_v52 = vpop.xlane.xlu0 %1209 }
 0x3b3   :  { %v1242_v51 = vadd.f32 %v1241_v17, %v1210_v52 }
 0x3b5   :  { %v1250_v58 = vsel %vm1249_vm10, %v1248_v8, %v1242_v51 }
 0x3b6   :  { %v1252_v62 = vsel %vm1251_vm11, %v1250_v58, %v2044_v21 }
 0x3b7   :  { %v1254_v28 = vsel %vm1253_vm12, %v1252_v62, %v630_v54 }
 0x3b8   :  { %v1256_v60 = vsel %vm1255_vm6, %v1254_v28, %v870_v61 }
 0x3ba   :  { %v1110_v38 = vpop.xlane.xlu0 %1109 }
 0x3bb   :  { %v1257_v59 = vsel %vm1171_vm15, %v1256_v60, %v1110_v38 }
 0x3bc   :  { %v1259_v16 = vsel %vm1258_vm7, %v1257_v59, 0.0 }
 0x3bd   :  { %1260 = vst [vmem:[%s2005_s3] sm:$0x3] %v1259_v16 }
 0x3be   :  { %1265 = vsyncpa [#allocation3], 1 }
 0x3bf   :  { %1266 = vsyncpa [#allocation5], 1 }

</bundles_post_ra>
